<compile_context>
chip_gen: v6e
topology: v6e:2x2x1
jax: 0.10.0
libtpu: 0.0.40
codegen_flags: <defaults>
</compile_context>

<pallas_src>
import jax
import jax.numpy as jnp
from jax.experimental import pallas as pl
from jax.experimental.pallas import tpu as pltpu

# ---- net_opt constants (from the PyTorch module) ----------------------------
EMBED_SIZE = 15                 # net_opt.embedding_size
LSTM_HIDDEN = 30                # net_opt.hidden_dim
MAX_DAYS = 10                   # net_opt.max_days
INPUT_DIM = 58                  # net_opt.input_dim
EMB_OPTIONS = (110, 4, 3, 3)    # net_opt.embedding_options
EMB_DIM = 2                     # net_opt.embedding_dim
CUTE_DIM = 2 * 4                # self.hidden_dim (2 lookups x embedding dim 4)
FIX_DIM = len(EMB_OPTIONS) * EMB_DIM          # 8
FC1_IN = CUTE_DIM + LSTM_HIDDEN + FIX_DIM     # 46
FC1_OUT = 32

# ---- kernel-side layout constants -------------------------------------------
HP = 32                         # LSTM hidden padded 30 -> 32  (4*HP = 128 lanes)
GP = 4 * HP                     # 128 gate lanes

# LSTM slab (LSTM_ROWS, 128): rows 0:58 w_in | 64 b_in | 72:104 w_hh
R_WIN, R_BIN, R_WHH = 0, 64, 72
LSTM_ROWS = 104

# Head slab (HEAD_ROWS, 32):
#   0:32 w1_lstm | 32 b1 | 40:72 w2 (lanes 0:16) | 72 b2 | 80:96 w3 (lane 0) |
#   112 b3 | 120: folded embedding tables (fc1-space rows, padding row 0 = 0)
R_W1, R_B1, R_W2, R_B2, R_W3, R_B3 = 0, 32, 40, 72, 80, 112
HEAD_EMB_BASE = 120
CUTE_ROWS = 15
_offs = [HEAD_EMB_BASE, HEAD_EMB_BASE + CUTE_ROWS]      # 2 cute lookups
_nxt = HEAD_EMB_BASE + 2 * CUTE_ROWS
for _n in EMB_OPTIONS:                                  # 4 fix lookups
    _offs.append(_nxt)
    _nxt += _n
EMB_OFFS = tuple(_offs)                                 # (120, 135, 150, 260, 264, 267)
HEAD_ROWS = ((_nxt + 7) // 8) * 8                       # 272


# =============================================================================
# Fused kernel: LSTM recurrence + in-kernel embedding gathers + fc1/fc2/fc3.
# Signature (PrefetchScalarGridSpec): (scalar_prefetch..., inputs..., outputs)
# =============================================================================
def _convcute_kernel(i_x_ref, f_x_ref, tx_ref, lstm_ref, head_ref, out_ref):
    B = tx_ref.shape[0]
    T = tx_ref.shape[1]

    # ---- LSTM weights: one slab, three static slices, loaded once ----------
    w_in = lstm_ref[R_WIN:R_WIN + INPUT_DIM, :]          # (58, 128)
    b_in = lstm_ref[R_BIN:R_BIN + 1, :]                  # (1, 128)
    w_hh = lstm_ref[R_WHH:R_WHH + HP, :]                 # (32, 128)

    # ---- Input-side gate pre-activations for ALL steps --------------------
    # One (T, 58) x (58, 128) MXU matmul per batch row (leading-dim ref index
    # only), then per-step (B, 128) rows are assembled with static slices.
    # All of this is independent of the recurrence, so the scheduler can
    # overlap it with the serial loop below.
    xg_b = [jnp.dot(tx_ref[b], w_in, preferred_element_type=jnp.float32) + b_in
            for b in range(B)]                           # B x (T, 128)
    xg = [jnp.concatenate([xb[t:t + 1, :] for xb in xg_b], axis=0)
          for t in range(T)]                             # T x (B, 128)
    # TODO(synk): for large B, stage xg in a VMEM scratch and add a batch grid
    # (parallel semantics) instead of holding all steps live in vregs.

    # ---- Recurrence (the only serial critical path) ------------------------
    # Hidden padded to 32 so each gate is a 32-lane-aligned slice of the
    # 128-lane gates vreg; padded lanes are exactly zero throughout
    # (zero gate columns + zero bias => c_pad = 0.5*c_pad, h_pad = 0).
    h = jnp.zeros((B, HP), jnp.float32)
    c = jnp.zeros((B, HP), jnp.float32)
    for t in range(T):                                   # static unroll, T = 10
        gates = xg[t] + jnp.dot(h, w_hh, preferred_element_type=jnp.float32)
        # Full-vreg nonlinearities (EUP slot is free) + aligned gate slices.
        sg = jax.nn.sigmoid(gates)
        tg = jnp.tanh(gates)
        i_g = sg[:, 0 * HP:1 * HP]                       # packed order: i, f, o | g
        f_g = sg[:, 1 * HP:2 * HP]
        o_g = sg[:, 2 * HP:3 * HP]
        g_g = tg[:, 3 * HP:4 * HP]
        c = f_g * c + i_g * g_g
        h = o_g * jnp.tanh(c)

    # ---- cute / fix embeddings: in-kernel gather of fc1-space rows ---------
    # Each table row was pre-multiplied by its fc1 weight block at pack time,
    # so the 6 gathered (1, 32) rows per sample simply sum into the fc1
    # pre-activation. Indices come from SMEM (scalar prefetch).
    # TODO(synk): for large B replace this unrolled per-sample gather with a
    # vectorized gather / DMA gather.
    rows = []
    for b in range(B):
        acc = head_ref[pl.ds(EMB_OFFS[0] + i_x_ref[b, 0], 1), :]
        acc = acc + head_ref[pl.ds(EMB_OFFS[1] + i_x_ref[b, 1], 1), :]
        for j in range(len(EMB_OPTIONS)):
            acc = acc + head_ref[pl.ds(EMB_OFFS[2 + j] + f_x_ref[b, j], 1), :]
        rows.append(acc)
    emb = jnp.concatenate(rows, axis=0)                  # (B, 32)

    # ---- Head: fc1 -> relu -> fc2 -> relu -> fc3 (all 32-lane padded) ------
    h1 = jnp.maximum(
        jnp.dot(h, head_ref[R_W1:R_W1 + HP, :], preferred_element_type=jnp.float32)
        + head_ref[R_B1:R_B1 + 1, :] + emb, 0.0)
    # TODO(synk): F.dropout(training=self.training) implemented as eval-mode
    # identity (no dropout at inference).
    h2 = jnp.maximum(
        jnp.dot(h1, head_ref[R_W2:R_W2 + FC1_OUT, :], preferred_element_type=jnp.float32)
        + head_ref[R_B2:R_B2 + 1, :], 0.0)               # lanes 16:32 stay 0
    o = (jnp.dot(h2, head_ref[R_W3:R_W3 + FC1_OUT, :], preferred_element_type=jnp.float32)
         + head_ref[R_B3:R_B3 + 1, :])                   # (B, 32), lane 0 = fc3 out
    out_ref[...] = o[:, 0:1]


# =============================================================================
# Parameters: raw PyTorch-shaped params, plus the packed slabs for the kernel.
# =============================================================================
def init_params(key):
    ks = iter(jax.random.split(key, 32))

    def nrm(shape, scale=0.1):
        return scale * jax.random.normal(next(ks), shape, jnp.float32)

    Hd = LSTM_HIDDEN
    raw = {}
    # embedding: Linear(58, 15)
    raw["w_emb"] = nrm((EMBED_SIZE, INPUT_DIM))
    raw["b_emb"] = nrm((EMBED_SIZE,))
    # nn.LSTM(15, 30): torch gate order (i, f, g, o)
    raw["w_ih"] = nrm((4 * Hd, EMBED_SIZE))
    raw["w_hh"] = nrm((4 * Hd, Hd))
    raw["b_ih"] = nrm((4 * Hd,))
    raw["b_hh"] = nrm((4 * Hd,))
    # fix_embedding tables (padding_idx=0 -> row 0 zeroed), fix_cute table
    raw["fix_tables"] = tuple(nrm((n, EMB_DIM)).at[0].set(0.0)
                              for n in EMB_OPTIONS)
    raw["cute_table"] = nrm((15, 4)).at[0].set(0.0)
    # fc1 / fc2 / fc3
    raw["w1"] = nrm((FC1_OUT, FC1_IN))
    raw["b1"] = nrm((FC1_OUT,))
    raw["w2"] = nrm((16, FC1_OUT))
    raw["b2"] = nrm((16,))
    raw["w3"] = nrm((1, 16))
    raw["b3"] = nrm((1,))
    return raw


def _pad_gate_blocks(m):
    """(4*Hd, ...) -> (4*HP, ...), zero-padding each of the 4 gate blocks."""
    m4 = m.reshape((4, LSTM_HIDDEN) + m.shape[1:])
    pad = [(0, 0), (0, HP - LSTM_HIDDEN)] + [(0, 0)] * (m.ndim - 1)
    return jnp.pad(m4, pad).reshape((4 * HP,) + m.shape[1:])


def pack_params(raw):
    """Fold embedding Linear into LSTM input weights, pad Hd 30->32, permute
    gates (i,f,g,o)->(i,f,o,g), fold emb tables into fc1 space, pack slabs."""
    Hd = LSTM_HIDDEN
    perm = jnp.concatenate([jnp.arange(0, 2 * Hd),
                            jnp.arange(3 * Hd, 4 * Hd),
                            jnp.arange(2 * Hd, 3 * Hd)])
    w_ih = _pad_gate_blocks(raw["w_ih"][perm])                 # (128, 15)
    w_hh = _pad_gate_blocks(raw["w_hh"][perm])                 # (128, 30)
    b_g = _pad_gate_blocks((raw["b_ih"] + raw["b_hh"])[perm])  # (128,)

    w_in = raw["w_emb"].T @ w_ih.T                             # (58, 128)
    b_in = raw["b_emb"] @ w_ih.T + b_g                         # (128,)
    w_hh_t = jnp.pad(w_hh.T, ((0, HP - Hd), (0, 0)))           # (32, 128)

    lstm_w = jnp.zeros((LSTM_ROWS, GP), jnp.float32)
    lstm_w = lstm_w.at[R_WIN:R_WIN + INPUT_DIM].set(w_in)
    lstm_w = lstm_w.at[R_BIN].set(b_in)
    lstm_w = lstm_w.at[R_WHH:R_WHH + HP].set(w_hh_t)

    w1t = raw["w1"].T                                          # (46, 32)
    head = jnp.zeros((HEAD_ROWS, FC1_OUT), jnp.float32)
    head = head.at[R_W1:R_W1 + Hd].set(w1t[CUTE_DIM:CUTE_DIM + Hd])   # padded rows -> 0
    head = head.at[R_B1].set(raw["b1"])
    head = head.at[R_W2:R_W2 + FC1_OUT, 0:16].set(raw["w2"].T)
    head = head.at[R_B2, 0:16].set(raw["b2"])
    head = head.at[R_W3:R_W3 + 16, 0:1].set(raw["w3"].T)
    head = head.at[R_B3, 0].set(raw["b3"][0])
    # Embedding tables folded into fc1 space (row 0 stays all-zero: padding_idx).
    head = head.at[EMB_OFFS[0]:EMB_OFFS[0] + CUTE_ROWS].set(raw["cute_table"] @ w1t[0:4])
    head = head.at[EMB_OFFS[1]:EMB_OFFS[1] + CUTE_ROWS].set(raw["cute_table"] @ w1t[4:8])
    fix_base = CUTE_DIM + Hd                                   # 38
    for j, n in enumerate(EMB_OPTIONS):
        blk = w1t[fix_base + 2 * j: fix_base + 2 * (j + 1)]    # (2, 32)
        head = head.at[EMB_OFFS[2 + j]:EMB_OFFS[2 + j] + n].set(raw["fix_tables"][j] @ blk)

    return {"lstm_w": lstm_w, "head_w": head}


# =============================================================================
# Forward pass: single fused pallas_call, zero host-side preprocessing.
# =============================================================================
@jax.jit
def convcute_forward(params, i_x, t_x, f_x):
    B = t_x.shape[0]
    grid_spec = pltpu.PrefetchScalarGridSpec(
        num_scalar_prefetch=2,                 # i_x, f_x -> SMEM
        grid=(1,),                             # single program; tiny shapes
        in_specs=[
            pl.BlockSpec((B, MAX_DAYS, INPUT_DIM), lambda g, ix, fx: (0, 0, 0)),
            pl.BlockSpec((LSTM_ROWS, GP), lambda g, ix, fx: (0, 0)),
            pl.BlockSpec((HEAD_ROWS, FC1_OUT), lambda g, ix, fx: (0, 0)),
        ],
        out_specs=pl.BlockSpec((B, 1), lambda g, ix, fx: (0, 0)),
    )
    # TODO(synk): for large batches, tile B with a parallel grid axis (v7x dual
    # TensorCore) and size tiles for 64 MiB/TC VMEM; unnecessary at B=2.
    return pl.pallas_call(
        _convcute_kernel,
        out_shape=jax.ShapeDtypeStruct((B, 1), jnp.float32),
        grid_spec=grid_spec,
        compiler_params=pltpu.CompilerParams(
            dimension_semantics=("arbitrary",)),
    )(i_x.astype(jnp.int32), f_x.astype(jnp.int32),
      t_x, params["lstm_w"], params["head_w"])


# =============================================================================
# Pure-JAX reference (mirrors the PyTorch forward exactly, eval mode).
# =============================================================================
def reference_forward(raw, i_x, t_x, f_x):
    Hd = LSTM_HIDDEN
    B = i_x.shape[0]
    h = jnp.zeros((B, Hd), jnp.float32)
    c = jnp.zeros((B, Hd), jnp.float32)
    for t in range(MAX_DAYS):
        emb = t_x[:, t] @ raw["w_emb"].T + raw["b_emb"]
        gates = (emb @ raw["w_ih"].T + raw["b_ih"]
                 + h @ raw["w_hh"].T + raw["b_hh"])
        i_g = jax.nn.sigmoid(gates[:, 0 * Hd:1 * Hd])
        f_g = jax.nn.sigmoid(gates[:, 1 * Hd:2 * Hd])
        g_g = jnp.tanh(gates[:, 2 * Hd:3 * Hd])
        o_g = jax.nn.sigmoid(gates[:, 3 * Hd:4 * Hd])
        c = f_g * c + i_g * g_g
        h = o_g * jnp.tanh(c)
    out_x = h
    fix_x = jnp.concatenate(
        [raw["fix_tables"][j][f_x[:, j]] for j in range(len(EMB_OPTIONS))],
        axis=1)
    cute_x = jnp.concatenate(
        [raw["cute_table"][i_x[:, j]] for j in range(2)], axis=1)
    x = jnp.concatenate((cute_x, out_x, fix_x), axis=1)
    x = jnp.maximum(x @ raw["w1"].T + raw["b1"], 0.0)
    x = jnp.maximum(x @ raw["w2"].T + raw["b2"], 0.0)
    return x @ raw["w3"].T + raw["b3"]


# =============================================================================
if __name__ == "__main__":
    key = jax.random.PRNGKey(0)
    k_i, k_t, k_f, k_p = jax.random.split(key, 4)

    B = 2
    i_x = jax.random.randint(k_i, (B, 2), 0, 15)                 # fix_cute indices
    t_x = jax.random.normal(k_t, (B, MAX_DAYS, INPUT_DIM), jnp.float32)
    fks = jax.random.split(k_f, len(EMB_OPTIONS))
    f_x = jnp.stack([jax.random.randint(fks[j], (B,), 0, n)
                     for j, n in enumerate(EMB_OPTIONS)], axis=1)  # (B, 4)

    raw = init_params(k_p)
    params = pack_params(raw)

    y = convcute_forward(params, i_x, t_x, f_x)
    y = jax.block_until_ready(y)

    y_ref = reference_forward(raw, i_x, t_x, f_x)

    assert y.shape == (B, 1), y.shape
    assert bool(jnp.all(jnp.isfinite(y))), y
    assert bool(jnp.allclose(y, y_ref, atol=1e-3, rtol=1e-3)), (y, y_ref)
    print("KERNEL_OK")
</pallas_src>

<mosaic_0001>
module attributes {stable_mosaic.version = 11 : i64} {
  func.func @_convcute_kernel(%arg0: i32, %arg1: memref<2x2xi32, #tpu.memory_space<smem>>, %arg2: memref<2x4xi32, #tpu.memory_space<smem>>, %arg3: memref<2x10x58xf32, #tpu.memory_space<vmem>>, %arg4: memref<104x128xf32, #tpu.memory_space<vmem>>, %arg5: memref<272x32xf32, #tpu.memory_space<vmem>>, %arg6: memref<2x1xf32, #tpu.memory_space<vmem>>) attributes {dimension_semantics = [#tpu.dimension_semantics<arbitrary>], iteration_bounds = array<i64: 1>, scalar_prefetch = 2 : i64, scratch_operands = 0 : i64, tpu.core_type = #tpu.core_type<tc>, window_params = [{pipeline_mode = #tpu.pipeline_mode<synchronous>, transform_indices = @transform_0, window_bounds = array<i64: 2, 10, 58>}, {pipeline_mode = #tpu.pipeline_mode<synchronous>, transform_indices = @transform_1, window_bounds = array<i64: 104, 128>}, {pipeline_mode = #tpu.pipeline_mode<synchronous>, transform_indices = @transform_2, window_bounds = array<i64: 272, 32>}, {pipeline_mode = #tpu.pipeline_mode<synchronous>, transform_indices = @transform_3, window_bounds = array<i64: 2, 1>}]} {
    %c0 = arith.constant 0 : index
    %c0_0 = arith.constant 0 : index
    %0 = vector.load %arg4[%c0, %c0_0] : memref<104x128xf32, #tpu.memory_space<vmem>>, vector<58x128xf32>
    %c64 = arith.constant 64 : index
    %c0_1 = arith.constant 0 : index
    %1 = vector.load %arg4[%c64, %c0_1] : memref<104x128xf32, #tpu.memory_space<vmem>>, vector<1x128xf32>
    %c72 = arith.constant 72 : index
    %c0_2 = arith.constant 0 : index
    %2 = vector.load %arg4[%c72, %c0_2] : memref<104x128xf32, #tpu.memory_space<vmem>>, vector<32x128xf32>
    %c0_3 = arith.constant 0 : index
    %c0_4 = arith.constant 0 : index
    %c0_5 = arith.constant 0 : index
    %3 = vector.load %arg3[%c0_3, %c0_4, %c0_5] : memref<2x10x58xf32, #tpu.memory_space<vmem>>, vector<1x10x58xf32>
    %4 = vector.shape_cast %3 : vector<1x10x58xf32> to vector<10x58xf32>
    %cst = arith.constant dense<0.000000e+00> : vector<10x128xf32>
    %5 = tpu.matmul %4, %0, %cst {dimension_numbers = #tpu.dot_dimension_numbers<[1], [0], [0], [1], [0, 0, 1, 1], [], []>} : vector<10x58xf32>, vector<58x128xf32>, vector<10x128xf32> -> vector<10x128xf32>
    %6 = vector.broadcast %1 : vector<1x128xf32> to vector<10x128xf32>
    %7 = arith.addf %5, %6 : vector<10x128xf32>
    %c1 = arith.constant 1 : index
    %c0_6 = arith.constant 0 : index
    %c0_7 = arith.constant 0 : index
    %8 = vector.load %arg3[%c1, %c0_6, %c0_7] : memref<2x10x58xf32, #tpu.memory_space<vmem>>, vector<1x10x58xf32>
    %9 = vector.shape_cast %8 : vector<1x10x58xf32> to vector<10x58xf32>
    %cst_8 = arith.constant dense<0.000000e+00> : vector<10x128xf32>
    %10 = tpu.matmul %9, %0, %cst_8 {dimension_numbers = #tpu.dot_dimension_numbers<[1], [0], [0], [1], [0, 0, 1, 1], [], []>} : vector<10x58xf32>, vector<58x128xf32>, vector<10x128xf32> -> vector<10x128xf32>
    %11 = vector.broadcast %1 : vector<1x128xf32> to vector<10x128xf32>
    %12 = arith.addf %10, %11 : vector<10x128xf32>
    %13 = vector.extract_strided_slice %7 {offsets = [0, 0], sizes = [1, 128], strides = [1, 1]} : vector<10x128xf32> to vector<1x128xf32>
    %14 = vector.extract_strided_slice %12 {offsets = [0, 0], sizes = [1, 128], strides = [1, 1]} : vector<10x128xf32> to vector<1x128xf32>
    %15 = tpu.concatenate %13, %14 in 0 : vector<1x128xf32>, vector<1x128xf32> -> vector<2x128xf32>
    %16 = vector.extract_strided_slice %7 {offsets = [1, 0], sizes = [1, 128], strides = [1, 1]} : vector<10x128xf32> to vector<1x128xf32>
    %17 = vector.extract_strided_slice %12 {offsets = [1, 0], sizes = [1, 128], strides = [1, 1]} : vector<10x128xf32> to vector<1x128xf32>
    %18 = tpu.concatenate %16, %17 in 0 : vector<1x128xf32>, vector<1x128xf32> -> vector<2x128xf32>
    %19 = vector.extract_strided_slice %7 {offsets = [2, 0], sizes = [1, 128], strides = [1, 1]} : vector<10x128xf32> to vector<1x128xf32>
    %20 = vector.extract_strided_slice %12 {offsets = [2, 0], sizes = [1, 128], strides = [1, 1]} : vector<10x128xf32> to vector<1x128xf32>
    %21 = tpu.concatenate %19, %20 in 0 : vector<1x128xf32>, vector<1x128xf32> -> vector<2x128xf32>
    %22 = vector.extract_strided_slice %7 {offsets = [3, 0], sizes = [1, 128], strides = [1, 1]} : vector<10x128xf32> to vector<1x128xf32>
    %23 = vector.extract_strided_slice %12 {offsets = [3, 0], sizes = [1, 128], strides = [1, 1]} : vector<10x128xf32> to vector<1x128xf32>
    %24 = tpu.concatenate %22, %23 in 0 : vector<1x128xf32>, vector<1x128xf32> -> vector<2x128xf32>
    %25 = vector.extract_strided_slice %7 {offsets = [4, 0], sizes = [1, 128], strides = [1, 1]} : vector<10x128xf32> to vector<1x128xf32>
    %26 = vector.extract_strided_slice %12 {offsets = [4, 0], sizes = [1, 128], strides = [1, 1]} : vector<10x128xf32> to vector<1x128xf32>
    %27 = tpu.concatenate %25, %26 in 0 : vector<1x128xf32>, vector<1x128xf32> -> vector<2x128xf32>
    %28 = vector.extract_strided_slice %7 {offsets = [5, 0], sizes = [1, 128], strides = [1, 1]} : vector<10x128xf32> to vector<1x128xf32>
    %29 = vector.extract_strided_slice %12 {offsets = [5, 0], sizes = [1, 128], strides = [1, 1]} : vector<10x128xf32> to vector<1x128xf32>
    %30 = tpu.concatenate %28, %29 in 0 : vector<1x128xf32>, vector<1x128xf32> -> vector<2x128xf32>
    %31 = vector.extract_strided_slice %7 {offsets = [6, 0], sizes = [1, 128], strides = [1, 1]} : vector<10x128xf32> to vector<1x128xf32>
    %32 = vector.extract_strided_slice %12 {offsets = [6, 0], sizes = [1, 128], strides = [1, 1]} : vector<10x128xf32> to vector<1x128xf32>
    %33 = tpu.concatenate %31, %32 in 0 : vector<1x128xf32>, vector<1x128xf32> -> vector<2x128xf32>
    %34 = vector.extract_strided_slice %7 {offsets = [7, 0], sizes = [1, 128], strides = [1, 1]} : vector<10x128xf32> to vector<1x128xf32>
    %35 = vector.extract_strided_slice %12 {offsets = [7, 0], sizes = [1, 128], strides = [1, 1]} : vector<10x128xf32> to vector<1x128xf32>
    %36 = tpu.concatenate %34, %35 in 0 : vector<1x128xf32>, vector<1x128xf32> -> vector<2x128xf32>
    %37 = vector.extract_strided_slice %7 {offsets = [8, 0], sizes = [1, 128], strides = [1, 1]} : vector<10x128xf32> to vector<1x128xf32>
    %38 = vector.extract_strided_slice %12 {offsets = [8, 0], sizes = [1, 128], strides = [1, 1]} : vector<10x128xf32> to vector<1x128xf32>
    %39 = tpu.concatenate %37, %38 in 0 : vector<1x128xf32>, vector<1x128xf32> -> vector<2x128xf32>
    %40 = vector.extract_strided_slice %7 {offsets = [9, 0], sizes = [1, 128], strides = [1, 1]} : vector<10x128xf32> to vector<1x128xf32>
    %41 = vector.extract_strided_slice %12 {offsets = [9, 0], sizes = [1, 128], strides = [1, 1]} : vector<10x128xf32> to vector<1x128xf32>
    %42 = tpu.concatenate %40, %41 in 0 : vector<1x128xf32>, vector<1x128xf32> -> vector<2x128xf32>
    %cst_9 = arith.constant 0.000000e+00 : f32
    %43 = vector.broadcast %cst_9 : f32 to vector<2x32xf32>
    %cst_10 = arith.constant 0.000000e+00 : f32
    %44 = vector.broadcast %cst_10 : f32 to vector<2x32xf32>
    %cst_11 = arith.constant dense<0.000000e+00> : vector<2x128xf32>
    %45 = tpu.matmul %43, %2, %cst_11 {dimension_numbers = #tpu.dot_dimension_numbers<[1], [0], [0], [1], [0, 0, 1, 1], [], []>} : vector<2x32xf32>, vector<32x128xf32>, vector<2x128xf32> -> vector<2x128xf32>
    %46 = arith.addf %15, %45 : vector<2x128xf32>
    %47 = arith.negf %46 : vector<2x128xf32>
    %48 = math.exp %47 : vector<2x128xf32>
    %cst_12 = arith.constant 1.000000e+00 : f32
    %49 = vector.broadcast %cst_12 : f32 to vector<2x128xf32>
    %50 = arith.addf %49, %48 : vector<2x128xf32>
    %51 = arith.divf %49, %50 : vector<2x128xf32>
    %52 = math.tanh %46 : vector<2x128xf32>
    %53 = vector.extract_strided_slice %51 {offsets = [0, 0], sizes = [2, 32], strides = [1, 1]} : vector<2x128xf32> to vector<2x32xf32>
    %54 = vector.extract_strided_slice %51 {offsets = [0, 32], sizes = [2, 32], strides = [1, 1]} : vector<2x128xf32> to vector<2x32xf32>
    %55 = vector.extract_strided_slice %51 {offsets = [0, 64], sizes = [2, 32], strides = [1, 1]} : vector<2x128xf32> to vector<2x32xf32>
    %56 = vector.extract_strided_slice %52 {offsets = [0, 96], sizes = [2, 32], strides = [1, 1]} : vector<2x128xf32> to vector<2x32xf32>
    %57 = arith.mulf %54, %44 : vector<2x32xf32>
    %58 = arith.mulf %53, %56 : vector<2x32xf32>
    %59 = arith.addf %57, %58 : vector<2x32xf32>
    %60 = math.tanh %59 : vector<2x32xf32>
    %61 = arith.mulf %55, %60 : vector<2x32xf32>
    %cst_13 = arith.constant dense<0.000000e+00> : vector<2x128xf32>
    %62 = tpu.matmul %61, %2, %cst_13 {dimension_numbers = #tpu.dot_dimension_numbers<[1], [0], [0], [1], [0, 0, 1, 1], [], []>} : vector<2x32xf32>, vector<32x128xf32>, vector<2x128xf32> -> vector<2x128xf32>
    %63 = arith.addf %18, %62 : vector<2x128xf32>
    %64 = arith.negf %63 : vector<2x128xf32>
    %65 = math.exp %64 : vector<2x128xf32>
    %cst_14 = arith.constant 1.000000e+00 : f32
    %66 = vector.broadcast %cst_14 : f32 to vector<2x128xf32>
    %67 = arith.addf %66, %65 : vector<2x128xf32>
    %68 = arith.divf %66, %67 : vector<2x128xf32>
    %69 = math.tanh %63 : vector<2x128xf32>
    %70 = vector.extract_strided_slice %68 {offsets = [0, 0], sizes = [2, 32], strides = [1, 1]} : vector<2x128xf32> to vector<2x32xf32>
    %71 = vector.extract_strided_slice %68 {offsets = [0, 32], sizes = [2, 32], strides = [1, 1]} : vector<2x128xf32> to vector<2x32xf32>
    %72 = vector.extract_strided_slice %68 {offsets = [0, 64], sizes = [2, 32], strides = [1, 1]} : vector<2x128xf32> to vector<2x32xf32>
    %73 = vector.extract_strided_slice %69 {offsets = [0, 96], sizes = [2, 32], strides = [1, 1]} : vector<2x128xf32> to vector<2x32xf32>
    %74 = arith.mulf %71, %59 : vector<2x32xf32>
    %75 = arith.mulf %70, %73 : vector<2x32xf32>
    %76 = arith.addf %74, %75 : vector<2x32xf32>
    %77 = math.tanh %76 : vector<2x32xf32>
    %78 = arith.mulf %72, %77 : vector<2x32xf32>
    %cst_15 = arith.constant dense<0.000000e+00> : vector<2x128xf32>
    %79 = tpu.matmul %78, %2, %cst_15 {dimension_numbers = #tpu.dot_dimension_numbers<[1], [0], [0], [1], [0, 0, 1, 1], [], []>} : vector<2x32xf32>, vector<32x128xf32>, vector<2x128xf32> -> vector<2x128xf32>
    %80 = arith.addf %21, %79 : vector<2x128xf32>
    %81 = arith.negf %80 : vector<2x128xf32>
    %82 = math.exp %81 : vector<2x128xf32>
    %cst_16 = arith.constant 1.000000e+00 : f32
    %83 = vector.broadcast %cst_16 : f32 to vector<2x128xf32>
    %84 = arith.addf %83, %82 : vector<2x128xf32>
    %85 = arith.divf %83, %84 : vector<2x128xf32>
    %86 = math.tanh %80 : vector<2x128xf32>
    %87 = vector.extract_strided_slice %85 {offsets = [0, 0], sizes = [2, 32], strides = [1, 1]} : vector<2x128xf32> to vector<2x32xf32>
    %88 = vector.extract_strided_slice %85 {offsets = [0, 32], sizes = [2, 32], strides = [1, 1]} : vector<2x128xf32> to vector<2x32xf32>
    %89 = vector.extract_strided_slice %85 {offsets = [0, 64], sizes = [2, 32], strides = [1, 1]} : vector<2x128xf32> to vector<2x32xf32>
    %90 = vector.extract_strided_slice %86 {offsets = [0, 96], sizes = [2, 32], strides = [1, 1]} : vector<2x128xf32> to vector<2x32xf32>
    %91 = arith.mulf %88, %76 : vector<2x32xf32>
    %92 = arith.mulf %87, %90 : vector<2x32xf32>
    %93 = arith.addf %91, %92 : vector<2x32xf32>
    %94 = math.tanh %93 : vector<2x32xf32>
    %95 = arith.mulf %89, %94 : vector<2x32xf32>
    %cst_17 = arith.constant dense<0.000000e+00> : vector<2x128xf32>
    %96 = tpu.matmul %95, %2, %cst_17 {dimension_numbers = #tpu.dot_dimension_numbers<[1], [0], [0], [1], [0, 0, 1, 1], [], []>} : vector<2x32xf32>, vector<32x128xf32>, vector<2x128xf32> -> vector<2x128xf32>
    %97 = arith.addf %24, %96 : vector<2x128xf32>
    %98 = arith.negf %97 : vector<2x128xf32>
    %99 = math.exp %98 : vector<2x128xf32>
    %cst_18 = arith.constant 1.000000e+00 : f32
    %100 = vector.broadcast %cst_18 : f32 to vector<2x128xf32>
    %101 = arith.addf %100, %99 : vector<2x128xf32>
    %102 = arith.divf %100, %101 : vector<2x128xf32>
    %103 = math.tanh %97 : vector<2x128xf32>
    %104 = vector.extract_strided_slice %102 {offsets = [0, 0], sizes = [2, 32], strides = [1, 1]} : vector<2x128xf32> to vector<2x32xf32>
    %105 = vector.extract_strided_slice %102 {offsets = [0, 32], sizes = [2, 32], strides = [1, 1]} : vector<2x128xf32> to vector<2x32xf32>
    %106 = vector.extract_strided_slice %102 {offsets = [0, 64], sizes = [2, 32], strides = [1, 1]} : vector<2x128xf32> to vector<2x32xf32>
    %107 = vector.extract_strided_slice %103 {offsets = [0, 96], sizes = [2, 32], strides = [1, 1]} : vector<2x128xf32> to vector<2x32xf32>
    %108 = arith.mulf %105, %93 : vector<2x32xf32>
    %109 = arith.mulf %104, %107 : vector<2x32xf32>
    %110 = arith.addf %108, %109 : vector<2x32xf32>
    %111 = math.tanh %110 : vector<2x32xf32>
    %112 = arith.mulf %106, %111 : vector<2x32xf32>
    %cst_19 = arith.constant dense<0.000000e+00> : vector<2x128xf32>
    %113 = tpu.matmul %112, %2, %cst_19 {dimension_numbers = #tpu.dot_dimension_numbers<[1], [0], [0], [1], [0, 0, 1, 1], [], []>} : vector<2x32xf32>, vector<32x128xf32>, vector<2x128xf32> -> vector<2x128xf32>
    %114 = arith.addf %27, %113 : vector<2x128xf32>
    %115 = arith.negf %114 : vector<2x128xf32>
    %116 = math.exp %115 : vector<2x128xf32>
    %cst_20 = arith.constant 1.000000e+00 : f32
    %117 = vector.broadcast %cst_20 : f32 to vector<2x128xf32>
    %118 = arith.addf %117, %116 : vector<2x128xf32>
    %119 = arith.divf %117, %118 : vector<2x128xf32>
    %120 = math.tanh %114 : vector<2x128xf32>
    %121 = vector.extract_strided_slice %119 {offsets = [0, 0], sizes = [2, 32], strides = [1, 1]} : vector<2x128xf32> to vector<2x32xf32>
    %122 = vector.extract_strided_slice %119 {offsets = [0, 32], sizes = [2, 32], strides = [1, 1]} : vector<2x128xf32> to vector<2x32xf32>
    %123 = vector.extract_strided_slice %119 {offsets = [0, 64], sizes = [2, 32], strides = [1, 1]} : vector<2x128xf32> to vector<2x32xf32>
    %124 = vector.extract_strided_slice %120 {offsets = [0, 96], sizes = [2, 32], strides = [1, 1]} : vector<2x128xf32> to vector<2x32xf32>
    %125 = arith.mulf %122, %110 : vector<2x32xf32>
    %126 = arith.mulf %121, %124 : vector<2x32xf32>
    %127 = arith.addf %125, %126 : vector<2x32xf32>
    %128 = math.tanh %127 : vector<2x32xf32>
    %129 = arith.mulf %123, %128 : vector<2x32xf32>
    %cst_21 = arith.constant dense<0.000000e+00> : vector<2x128xf32>
    %130 = tpu.matmul %129, %2, %cst_21 {dimension_numbers = #tpu.dot_dimension_numbers<[1], [0], [0], [1], [0, 0, 1, 1], [], []>} : vector<2x32xf32>, vector<32x128xf32>, vector<2x128xf32> -> vector<2x128xf32>
    %131 = arith.addf %30, %130 : vector<2x128xf32>
    %132 = arith.negf %131 : vector<2x128xf32>
    %133 = math.exp %132 : vector<2x128xf32>
    %cst_22 = arith.constant 1.000000e+00 : f32
    %134 = vector.broadcast %cst_22 : f32 to vector<2x128xf32>
    %135 = arith.addf %134, %133 : vector<2x128xf32>
    %136 = arith.divf %134, %135 : vector<2x128xf32>
    %137 = math.tanh %131 : vector<2x128xf32>
    %138 = vector.extract_strided_slice %136 {offsets = [0, 0], sizes = [2, 32], strides = [1, 1]} : vector<2x128xf32> to vector<2x32xf32>
    %139 = vector.extract_strided_slice %136 {offsets = [0, 32], sizes = [2, 32], strides = [1, 1]} : vector<2x128xf32> to vector<2x32xf32>
    %140 = vector.extract_strided_slice %136 {offsets = [0, 64], sizes = [2, 32], strides = [1, 1]} : vector<2x128xf32> to vector<2x32xf32>
    %141 = vector.extract_strided_slice %137 {offsets = [0, 96], sizes = [2, 32], strides = [1, 1]} : vector<2x128xf32> to vector<2x32xf32>
    %142 = arith.mulf %139, %127 : vector<2x32xf32>
    %143 = arith.mulf %138, %141 : vector<2x32xf32>
    %144 = arith.addf %142, %143 : vector<2x32xf32>
    %145 = math.tanh %144 : vector<2x32xf32>
    %146 = arith.mulf %140, %145 : vector<2x32xf32>
    %cst_23 = arith.constant dense<0.000000e+00> : vector<2x128xf32>
    %147 = tpu.matmul %146, %2, %cst_23 {dimension_numbers = #tpu.dot_dimension_numbers<[1], [0], [0], [1], [0, 0, 1, 1], [], []>} : vector<2x32xf32>, vector<32x128xf32>, vector<2x128xf32> -> vector<2x128xf32>
    %148 = arith.addf %33, %147 : vector<2x128xf32>
    %149 = arith.negf %148 : vector<2x128xf32>
    %150 = math.exp %149 : vector<2x128xf32>
    %cst_24 = arith.constant 1.000000e+00 : f32
    %151 = vector.broadcast %cst_24 : f32 to vector<2x128xf32>
    %152 = arith.addf %151, %150 : vector<2x128xf32>
    %153 = arith.divf %151, %152 : vector<2x128xf32>
    %154 = math.tanh %148 : vector<2x128xf32>
    %155 = vector.extract_strided_slice %153 {offsets = [0, 0], sizes = [2, 32], strides = [1, 1]} : vector<2x128xf32> to vector<2x32xf32>
    %156 = vector.extract_strided_slice %153 {offsets = [0, 32], sizes = [2, 32], strides = [1, 1]} : vector<2x128xf32> to vector<2x32xf32>
    %157 = vector.extract_strided_slice %153 {offsets = [0, 64], sizes = [2, 32], strides = [1, 1]} : vector<2x128xf32> to vector<2x32xf32>
    %158 = vector.extract_strided_slice %154 {offsets = [0, 96], sizes = [2, 32], strides = [1, 1]} : vector<2x128xf32> to vector<2x32xf32>
    %159 = arith.mulf %156, %144 : vector<2x32xf32>
    %160 = arith.mulf %155, %158 : vector<2x32xf32>
    %161 = arith.addf %159, %160 : vector<2x32xf32>
    %162 = math.tanh %161 : vector<2x32xf32>
    %163 = arith.mulf %157, %162 : vector<2x32xf32>
    %cst_25 = arith.constant dense<0.000000e+00> : vector<2x128xf32>
    %164 = tpu.matmul %163, %2, %cst_25 {dimension_numbers = #tpu.dot_dimension_numbers<[1], [0], [0], [1], [0, 0, 1, 1], [], []>} : vector<2x32xf32>, vector<32x128xf32>, vector<2x128xf32> -> vector<2x128xf32>
    %165 = arith.addf %36, %164 : vector<2x128xf32>
    %166 = arith.negf %165 : vector<2x128xf32>
    %167 = math.exp %166 : vector<2x128xf32>
    %cst_26 = arith.constant 1.000000e+00 : f32
    %168 = vector.broadcast %cst_26 : f32 to vector<2x128xf32>
    %169 = arith.addf %168, %167 : vector<2x128xf32>
    %170 = arith.divf %168, %169 : vector<2x128xf32>
    %171 = math.tanh %165 : vector<2x128xf32>
    %172 = vector.extract_strided_slice %170 {offsets = [0, 0], sizes = [2, 32], strides = [1, 1]} : vector<2x128xf32> to vector<2x32xf32>
    %173 = vector.extract_strided_slice %170 {offsets = [0, 32], sizes = [2, 32], strides = [1, 1]} : vector<2x128xf32> to vector<2x32xf32>
    %174 = vector.extract_strided_slice %170 {offsets = [0, 64], sizes = [2, 32], strides = [1, 1]} : vector<2x128xf32> to vector<2x32xf32>
    %175 = vector.extract_strided_slice %171 {offsets = [0, 96], sizes = [2, 32], strides = [1, 1]} : vector<2x128xf32> to vector<2x32xf32>
    %176 = arith.mulf %173, %161 : vector<2x32xf32>
    %177 = arith.mulf %172, %175 : vector<2x32xf32>
    %178 = arith.addf %176, %177 : vector<2x32xf32>
    %179 = math.tanh %178 : vector<2x32xf32>
    %180 = arith.mulf %174, %179 : vector<2x32xf32>
    %cst_27 = arith.constant dense<0.000000e+00> : vector<2x128xf32>
    %181 = tpu.matmul %180, %2, %cst_27 {dimension_numbers = #tpu.dot_dimension_numbers<[1], [0], [0], [1], [0, 0, 1, 1], [], []>} : vector<2x32xf32>, vector<32x128xf32>, vector<2x128xf32> -> vector<2x128xf32>
    %182 = arith.addf %39, %181 : vector<2x128xf32>
    %183 = arith.negf %182 : vector<2x128xf32>
    %184 = math.exp %183 : vector<2x128xf32>
    %cst_28 = arith.constant 1.000000e+00 : f32
    %185 = vector.broadcast %cst_28 : f32 to vector<2x128xf32>
    %186 = arith.addf %185, %184 : vector<2x128xf32>
    %187 = arith.divf %185, %186 : vector<2x128xf32>
    %188 = math.tanh %182 : vector<2x128xf32>
    %189 = vector.extract_strided_slice %187 {offsets = [0, 0], sizes = [2, 32], strides = [1, 1]} : vector<2x128xf32> to vector<2x32xf32>
    %190 = vector.extract_strided_slice %187 {offsets = [0, 32], sizes = [2, 32], strides = [1, 1]} : vector<2x128xf32> to vector<2x32xf32>
    %191 = vector.extract_strided_slice %187 {offsets = [0, 64], sizes = [2, 32], strides = [1, 1]} : vector<2x128xf32> to vector<2x32xf32>
    %192 = vector.extract_strided_slice %188 {offsets = [0, 96], sizes = [2, 32], strides = [1, 1]} : vector<2x128xf32> to vector<2x32xf32>
    %193 = arith.mulf %190, %178 : vector<2x32xf32>
    %194 = arith.mulf %189, %192 : vector<2x32xf32>
    %195 = arith.addf %193, %194 : vector<2x32xf32>
    %196 = math.tanh %195 : vector<2x32xf32>
    %197 = arith.mulf %191, %196 : vector<2x32xf32>
    %cst_29 = arith.constant dense<0.000000e+00> : vector<2x128xf32>
    %198 = tpu.matmul %197, %2, %cst_29 {dimension_numbers = #tpu.dot_dimension_numbers<[1], [0], [0], [1], [0, 0, 1, 1], [], []>} : vector<2x32xf32>, vector<32x128xf32>, vector<2x128xf32> -> vector<2x128xf32>
    %199 = arith.addf %42, %198 : vector<2x128xf32>
    %200 = arith.negf %199 : vector<2x128xf32>
    %201 = math.exp %200 : vector<2x128xf32>
    %cst_30 = arith.constant 1.000000e+00 : f32
    %202 = vector.broadcast %cst_30 : f32 to vector<2x128xf32>
    %203 = arith.addf %202, %201 : vector<2x128xf32>
    %204 = arith.divf %202, %203 : vector<2x128xf32>
    %205 = math.tanh %199 : vector<2x128xf32>
    %206 = vector.extract_strided_slice %204 {offsets = [0, 0], sizes = [2, 32], strides = [1, 1]} : vector<2x128xf32> to vector<2x32xf32>
    %207 = vector.extract_strided_slice %204 {offsets = [0, 32], sizes = [2, 32], strides = [1, 1]} : vector<2x128xf32> to vector<2x32xf32>
    %208 = vector.extract_strided_slice %204 {offsets = [0, 64], sizes = [2, 32], strides = [1, 1]} : vector<2x128xf32> to vector<2x32xf32>
    %209 = vector.extract_strided_slice %205 {offsets = [0, 96], sizes = [2, 32], strides = [1, 1]} : vector<2x128xf32> to vector<2x32xf32>
    %210 = arith.mulf %207, %195 : vector<2x32xf32>
    %211 = arith.mulf %206, %209 : vector<2x32xf32>
    %212 = arith.addf %210, %211 : vector<2x32xf32>
    %213 = math.tanh %212 : vector<2x32xf32>
    %214 = arith.mulf %208, %213 : vector<2x32xf32>
    %c0_31 = arith.constant 0 : index
    %c0_32 = arith.constant 0 : index
    %215 = memref.load %arg1[%c0_31, %c0_32] : memref<2x2xi32, #tpu.memory_space<smem>>
    %c120_i32 = arith.constant 120 : i32
    %216 = arith.addi %c120_i32, %215 : i32
    %217 = arith.index_cast %216 : i32 to index
    %c0_33 = arith.constant 0 : index
    %218 = vector.load %arg5[%217, %c0_33] : memref<272x32xf32, #tpu.memory_space<vmem>>, vector<1x32xf32>
    %c0_34 = arith.constant 0 : index
    %c1_35 = arith.constant 1 : index
    %219 = memref.load %arg1[%c0_34, %c1_35] : memref<2x2xi32, #tpu.memory_space<smem>>
    %c135_i32 = arith.constant 135 : i32
    %220 = arith.addi %c135_i32, %219 : i32
    %221 = arith.index_cast %220 : i32 to index
    %c0_36 = arith.constant 0 : index
    %222 = vector.load %arg5[%221, %c0_36] : memref<272x32xf32, #tpu.memory_space<vmem>>, vector<1x32xf32>
    %223 = arith.addf %218, %222 : vector<1x32xf32>
    %c0_37 = arith.constant 0 : index
    %c0_38 = arith.constant 0 : index
    %224 = memref.load %arg2[%c0_37, %c0_38] : memref<2x4xi32, #tpu.memory_space<smem>>
    %c150_i32 = arith.constant 150 : i32
    %225 = arith.addi %c150_i32, %224 : i32
    %226 = arith.index_cast %225 : i32 to index
    %c0_39 = arith.constant 0 : index
    %227 = vector.load %arg5[%226, %c0_39] : memref<272x32xf32, #tpu.memory_space<vmem>>, vector<1x32xf32>
    %228 = arith.addf %223, %227 : vector<1x32xf32>
    %c0_40 = arith.constant 0 : index
    %c1_41 = arith.constant 1 : index
    %229 = memref.load %arg2[%c0_40, %c1_41] : memref<2x4xi32, #tpu.memory_space<smem>>
    %c260_i32 = arith.constant 260 : i32
    %230 = arith.addi %c260_i32, %229 : i32
    %231 = arith.index_cast %230 : i32 to index
    %c0_42 = arith.constant 0 : index
    %232 = vector.load %arg5[%231, %c0_42] : memref<272x32xf32, #tpu.memory_space<vmem>>, vector<1x32xf32>
    %233 = arith.addf %228, %232 : vector<1x32xf32>
    %c0_43 = arith.constant 0 : index
    %c2 = arith.constant 2 : index
    %234 = memref.load %arg2[%c0_43, %c2] : memref<2x4xi32, #tpu.memory_space<smem>>
    %c264_i32 = arith.constant 264 : i32
    %235 = arith.addi %c264_i32, %234 : i32
    %236 = arith.index_cast %235 : i32 to index
    %c0_44 = arith.constant 0 : index
    %237 = vector.load %arg5[%236, %c0_44] : memref<272x32xf32, #tpu.memory_space<vmem>>, vector<1x32xf32>
    %238 = arith.addf %233, %237 : vector<1x32xf32>
    %c0_45 = arith.constant 0 : index
    %c3 = arith.constant 3 : index
    %239 = memref.load %arg2[%c0_45, %c3] : memref<2x4xi32, #tpu.memory_space<smem>>
    %c267_i32 = arith.constant 267 : i32
    %240 = arith.addi %c267_i32, %239 : i32
    %241 = arith.index_cast %240 : i32 to index
    %c0_46 = arith.constant 0 : index
    %242 = vector.load %arg5[%241, %c0_46] : memref<272x32xf32, #tpu.memory_space<vmem>>, vector<1x32xf32>
    %243 = arith.addf %238, %242 : vector<1x32xf32>
    %c1_47 = arith.constant 1 : index
    %c0_48 = arith.constant 0 : index
    %244 = memref.load %arg1[%c1_47, %c0_48] : memref<2x2xi32, #tpu.memory_space<smem>>
    %c120_i32_49 = arith.constant 120 : i32
    %245 = arith.addi %c120_i32_49, %244 : i32
    %246 = arith.index_cast %245 : i32 to index
    %c0_50 = arith.constant 0 : index
    %247 = vector.load %arg5[%246, %c0_50] : memref<272x32xf32, #tpu.memory_space<vmem>>, vector<1x32xf32>
    %c1_51 = arith.constant 1 : index
    %c1_52 = arith.constant 1 : index
    %248 = memref.load %arg1[%c1_51, %c1_52] : memref<2x2xi32, #tpu.memory_space<smem>>
    %c135_i32_53 = arith.constant 135 : i32
    %249 = arith.addi %c135_i32_53, %248 : i32
    %250 = arith.index_cast %249 : i32 to index
    %c0_54 = arith.constant 0 : index
    %251 = vector.load %arg5[%250, %c0_54] : memref<272x32xf32, #tpu.memory_space<vmem>>, vector<1x32xf32>
    %252 = arith.addf %247, %251 : vector<1x32xf32>
    %c1_55 = arith.constant 1 : index
    %c0_56 = arith.constant 0 : index
    %253 = memref.load %arg2[%c1_55, %c0_56] : memref<2x4xi32, #tpu.memory_space<smem>>
    %c150_i32_57 = arith.constant 150 : i32
    %254 = arith.addi %c150_i32_57, %253 : i32
    %255 = arith.index_cast %254 : i32 to index
    %c0_58 = arith.constant 0 : index
    %256 = vector.load %arg5[%255, %c0_58] : memref<272x32xf32, #tpu.memory_space<vmem>>, vector<1x32xf32>
    %257 = arith.addf %252, %256 : vector<1x32xf32>
    %c1_59 = arith.constant 1 : index
    %c1_60 = arith.constant 1 : index
    %258 = memref.load %arg2[%c1_59, %c1_60] : memref<2x4xi32, #tpu.memory_space<smem>>
    %c260_i32_61 = arith.constant 260 : i32
    %259 = arith.addi %c260_i32_61, %258 : i32
    %260 = arith.index_cast %259 : i32 to index
    %c0_62 = arith.constant 0 : index
    %261 = vector.load %arg5[%260, %c0_62] : memref<272x32xf32, #tpu.memory_space<vmem>>, vector<1x32xf32>
    %262 = arith.addf %257, %261 : vector<1x32xf32>
    %c1_63 = arith.constant 1 : index
    %c2_64 = arith.constant 2 : index
    %263 = memref.load %arg2[%c1_63, %c2_64] : memref<2x4xi32, #tpu.memory_space<smem>>
    %c264_i32_65 = arith.constant 264 : i32
    %264 = arith.addi %c264_i32_65, %263 : i32
    %265 = arith.index_cast %264 : i32 to index
    %c0_66 = arith.constant 0 : index
    %266 = vector.load %arg5[%265, %c0_66] : memref<272x32xf32, #tpu.memory_space<vmem>>, vector<1x32xf32>
    %267 = arith.addf %262, %266 : vector<1x32xf32>
    %c1_67 = arith.constant 1 : index
    %c3_68 = arith.constant 3 : index
    %268 = memref.load %arg2[%c1_67, %c3_68] : memref<2x4xi32, #tpu.memory_space<smem>>
    %c267_i32_69 = arith.constant 267 : i32
    %269 = arith.addi %c267_i32_69, %268 : i32
    %270 = arith.index_cast %269 : i32 to index
    %c0_70 = arith.constant 0 : index
    %271 = vector.load %arg5[%270, %c0_70] : memref<272x32xf32, #tpu.memory_space<vmem>>, vector<1x32xf32>
    %272 = arith.addf %267, %271 : vector<1x32xf32>
    %273 = tpu.concatenate %243, %272 in 0 : vector<1x32xf32>, vector<1x32xf32> -> vector<2x32xf32>
    %c0_71 = arith.constant 0 : index
    %c0_72 = arith.constant 0 : index
    %274 = vector.load %arg5[%c0_71, %c0_72] : memref<272x32xf32, #tpu.memory_space<vmem>>, vector<32x32xf32>
    %cst_73 = arith.constant dense<0.000000e+00> : vector<2x32xf32>
    %275 = tpu.matmul %214, %274, %cst_73 {dimension_numbers = #tpu.dot_dimension_numbers<[1], [0], [0], [1], [0, 0, 1, 1], [], []>} : vector<2x32xf32>, vector<32x32xf32>, vector<2x32xf32> -> vector<2x32xf32>
    %c32 = arith.constant 32 : index
    %c0_74 = arith.constant 0 : index
    %276 = vector.load %arg5[%c32, %c0_74] : memref<272x32xf32, #tpu.memory_space<vmem>>, vector<1x32xf32>
    %277 = vector.broadcast %276 : vector<1x32xf32> to vector<2x32xf32>
    %278 = arith.addf %275, %277 : vector<2x32xf32>
    %279 = arith.addf %278, %273 : vector<2x32xf32>
    %cst_75 = arith.constant 0.000000e+00 : f32
    %280 = vector.broadcast %cst_75 : f32 to vector<2x32xf32>
    %281 = arith.maximumf %279, %280 : vector<2x32xf32>
    %c40 = arith.constant 40 : index
    %c0_76 = arith.constant 0 : index
    %282 = vector.load %arg5[%c40, %c0_76] : memref<272x32xf32, #tpu.memory_space<vmem>>, vector<32x32xf32>
    %cst_77 = arith.constant dense<0.000000e+00> : vector<2x32xf32>
    %283 = tpu.matmul %281, %282, %cst_77 {dimension_numbers = #tpu.dot_dimension_numbers<[1], [0], [0], [1], [0, 0, 1, 1], [], []>} : vector<2x32xf32>, vector<32x32xf32>, vector<2x32xf32> -> vector<2x32xf32>
    %c72_78 = arith.constant 72 : index
    %c0_79 = arith.constant 0 : index
    %284 = vector.load %arg5[%c72_78, %c0_79] : memref<272x32xf32, #tpu.memory_space<vmem>>, vector<1x32xf32>
    %285 = vector.broadcast %284 : vector<1x32xf32> to vector<2x32xf32>
    %286 = arith.addf %283, %285 : vector<2x32xf32>
    %cst_80 = arith.constant 0.000000e+00 : f32
    %287 = vector.broadcast %cst_80 : f32 to vector<2x32xf32>
    %288 = arith.maximumf %286, %287 : vector<2x32xf32>
    %c80 = arith.constant 80 : index
    %c0_81 = arith.constant 0 : index
    %289 = vector.load %arg5[%c80, %c0_81] : memref<272x32xf32, #tpu.memory_space<vmem>>, vector<32x32xf32>
    %cst_82 = arith.constant dense<0.000000e+00> : vector<2x32xf32>
    %290 = tpu.matmul %288, %289, %cst_82 {dimension_numbers = #tpu.dot_dimension_numbers<[1], [0], [0], [1], [0, 0, 1, 1], [], []>} : vector<2x32xf32>, vector<32x32xf32>, vector<2x32xf32> -> vector<2x32xf32>
    %c112 = arith.constant 112 : index
    %c0_83 = arith.constant 0 : index
    %291 = vector.load %arg5[%c112, %c0_83] : memref<272x32xf32, #tpu.memory_space<vmem>>, vector<1x32xf32>
    %292 = vector.broadcast %291 : vector<1x32xf32> to vector<2x32xf32>
    %293 = arith.addf %290, %292 : vector<2x32xf32>
    %294 = vector.extract_strided_slice %293 {offsets = [0, 0], sizes = [2, 1], strides = [1, 1]} : vector<2x32xf32> to vector<2x1xf32>
    %c0_84 = arith.constant 0 : index
    %c0_85 = arith.constant 0 : index
    %295 = vector.load %arg6[%c0_84, %c0_85] : memref<2x1xf32, #tpu.memory_space<vmem>>, vector<2x1xf32>
    tpu.vector_store %arg6[%c0_84, %c0_85], %294 {strides = array<i32>} : memref<2x1xf32, #tpu.memory_space<vmem>>, vector<2x1xf32>,
    return
  }
  func.func @transform_0(%arg0: i32, %arg1: memref<2x2xi32, #tpu.memory_space<smem>>, %arg2: memref<2x4xi32, #tpu.memory_space<smem>>) -> (i32, i32, i32) {
    %c0_i32 = arith.constant 0 : i32
    %c0_i32_0 = arith.constant 0 : i32
    %c0_i32_1 = arith.constant 0 : i32
    %c0_i32_2 = arith.constant 0 : i32
    return %c0_i32, %c0_i32_0, %c0_i32_1 : i32, i32, i32
  }
  func.func @transform_1(%arg0: i32, %arg1: memref<2x2xi32, #tpu.memory_space<smem>>, %arg2: memref<2x4xi32, #tpu.memory_space<smem>>) -> (i32, i32) {
    %c0_i32 = arith.constant 0 : i32
    %c0_i32_0 = arith.constant 0 : i32
    %c0_i32_1 = arith.constant 0 : i32
    return %c0_i32, %c0_i32_0 : i32, i32
  }
  func.func @transform_2(%arg0: i32, %arg1: memref<2x2xi32, #tpu.memory_space<smem>>, %arg2: memref<2x4xi32, #tpu.memory_space<smem>>) -> (i32, i32) {
    %c0_i32 = arith.constant 0 : i32
    %c0_i32_0 = arith.constant 0 : i32
    %c0_i32_1 = arith.constant 0 : i32
    return %c0_i32, %c0_i32_0 : i32, i32
  }
  func.func @transform_3(%arg0: i32, %arg1: memref<2x2xi32, #tpu.memory_space<smem>>, %arg2: memref<2x4xi32, #tpu.memory_space<smem>>) -> (i32, i32) {
    %c0_i32 = arith.constant 0 : i32
    %c0_i32_0 = arith.constant 0 : i32
    %c0_i32_1 = arith.constant 0 : i32
    return %c0_i32, %c0_i32_0 : i32, i32
  }
}

</mosaic_0001>

<bundles_post_ra>
// kernel: convcute_forward.1
= control target key start
LH: loop header
LB: loop body
LE: loop exit
PB: predicated region body
PF: predicated region fallthrough
CT: control target
= control target key end

     0   :  { %s2429_s0 = inlined_call_operand.vmem [shape: s32[2,2], index: 0, kind: input, shape index: {}]   ;;  %s2430_s2 = inlined_call_operand.vmem [shape: f32[2,10,58], index: 2, kind: input, shape index: {}]   ;;  %s2431_s3 = inlined_call_operand.vmem [shape: f32[104,128], index: 3, kind: input, shape index: {}]   ;;  %s2432_s4 = inlined_call_operand.vmem [shape: f32[272,32], index: 4, kind: input, shape index: {}]   ;;  %s2433_s5 = inlined_call_operand.vmem [shape: f32[2,1], index: 5, kind: output, shape index: {}]   ;;  %s2434_s1 = inlined_call_operand.vmem [shape: s32[2,4], index: 1, kind: input, shape index: {}]  }
   0x1   :  { %s10_s20 = sshll.u32 %s2429_s0, 4  ;;  %s14_s23 = sshll.u32 %s2434_s1, 4  ;;  %s11_s20 = int_to_ptr.vmem [resolvable:$true] %s10_s20  ;;  %s15_s23 = int_to_ptr.vmem [resolvable:$true] %s14_s23 }
   0x2   :  { %s2012_s24 = scalar_lea.vmem %s11_s20, 32  ;;  %p2017_p1 = scmp.lt.s32.totalorder %s11_s20, %s11_s20 }
   0x3   :  { %p2013_p0 = scmp.ne.s32.totalorder %s11_s20, %s2012_s24  ;;  %p2018_p2 = scmp.lt.s32.totalorder %s2012_s24, %s2012_s24 }
   0x5   :  { %p2019_p3 = por %p2018_p2, %p2017_p1 }
   0x7   :  { %p2020_p4 = pnand %p2019_p3, %p2013_p0 }
   0x9   :  { %2023 = shalt.err (!%p2020_p4)  }
   0xa   :  { %s2038_s25 = smov [#allocation3]   ;;  %s2024_s26 = scalar_lea.vmem %s15_s23, 32 }
   0xb   :  { %13 = dma.vmem_to_smem %s11_s20, 32, %s2038_s25, [#allocation2] }
   0xc   :  { %p2025_p5 = scmp.ne.s32.totalorder %s15_s23, %s2024_s26  ;;  %p2029_p6 = scmp.lt.s32.totalorder %s15_s23, %s15_s23 }
   0xd   :  { %p2030_p7 = scmp.lt.s32.totalorder %s2024_s26, %s2024_s26 }
   0xf   :  { %p2031_p8 = por %p2030_p7, %p2029_p6 }
  0x11   :  { %p2032_p9 = pnand %p2031_p8, %p2025_p5 }
  0x13   :  { %2035 = shalt.err (!%p2032_p9)  }
  0x14   :  { %s2039_s0 = smov [#allocation4]  }
  0x15   :  { %17 = dma.vmem_to_smem %s15_s23, 32, %s2039_s0, [#allocation2] }
  0x16   :  { %2036 = dma.done.wait [#allocation2], 64 }
  0x17   :  { %2037 = vsyncadd [#allocation2], 4294967232 }
  0x18   :  { %19 = sfence }
  0x19   :  { %v33_v0 = vld [vmem:[%s2431_s3 + $0x38] sm:$0x3]  ;;  %vm52_vm0 = vcmask 1041408   ;;  %v32_v1 = vld [vmem:[%s2431_s3 + $0x30] sm:$0xff]  ;;  %v31_v2 = vld [vmem:[%s2431_s3 + $0x28] sm:$0xff]  ;;  %vm45_vm1 = vcmask 474112  }
  0x1a   :  { %1745 = vmatprep.subr.msk.mxu0 %vm52_vm0, %v33_v0  ;;  %1764 = vmatprep.subr.msk.mxu1 %vm52_vm0, %v33_v0  ;;  %v30_v3 = vld [vmem:[%s2431_s3 + $0x20] sm:$0xff]  ;;  %v29_v4 = vld [vmem:[%s2431_s3 + $0x18] sm:$0xff]  ;;  %v28_v5 = vld [vmem:[%s2431_s3 + $0x10] sm:$0xff]  ;;  %v2040_v13 = vmov 0.0   ;;  %vm2041_vm2 = vmmov 0   ;;  %vm218_vm3 = vcmask 1040384  }
  0x1b   :  { %1746 = vmatpush3.msk.msra.mxu0 %vm52_vm0, %v33_v0  ;;  %1765 = vmatpush3.msk.msra.mxu1 %vm52_vm0, %v33_v0  ;;  %v27_v6 = vld [vmem:[%s2431_s3 + $0x8] sm:$0xff]  ;;  %v26_v7 = vld [vmem:[%s2431_s3] sm:$0xff]  ;;  %v1608_v9 = vld [vmem:[%s2430_s2 + $0x10] sm:$0xff]  ;;  %s2043_s7 = smov 64   ;;  %vm262_vm4 = vcmask 261120   ;;  %s1642_s26 = sld [smem:[#allocation3 + $0x80]] }
  0x1c   :  { %1747 = vmatprep.subr.mxu0 %v32_v1  ;;  %1766 = vmatprep.subr.mxu1 %v32_v1  ;;  %v39_v8 = vld [vmem:[%s2430_s2] sm:$0xff]  ;;  %v40_v10 = vld [vmem:[%s2430_s2 + $0x8] sm:$0x3]  ;;  %v1609_v11 = vld [vmem:[%s2430_s2 + $0x18] sm:$0x3]  ;;  %s1644_s0 = sld [smem:[#allocation3 + $0x81]] }
  0x1d   :  { %1748 = vmatpush3.msra.mxu0 %v32_v1  ;;  %1767 = vmatpush3.msra.mxu1 %v32_v1  ;;  %v2119_v12 = vld [vmem:[%s2431_s3 + $0x60] sm:$0xff]  ;;  %v2125_v14 = vld [vmem:[%s2431_s3 + $0x58] sm:$0xff]  ;;  %v2135_v15 = vld [vmem:[%s2431_s3 + $0x50] sm:$0xff]  ;;  %s1261_s1 = sld [smem:[#allocation3]]  ;;  %vm1574_vm5 = vcmask 1024  }
  0x1e   :  { %1749 = vmatprep.subr.mxu0 %v31_v2  ;;  %1768 = vmatprep.subr.mxu1 %v31_v2  ;;  %v2144_v16 = vld [vmem:[%s2431_s3 + $0x48] sm:$0xff]  ;;  %v1604_v17 = vld [vmem:[%s2431_s3 + $0x40] ss:$0 sm:$0xff]  ;;  %s2042_s3 = smov 32   ;;  %s1633_s2 = sld [smem:[#allocation3 + $0x1]] }
  0x1f   :  { %1750 = vmatpush3.msra.mxu0 %v31_v2  ;;  %1769 = vmatpush3.msra.mxu1 %v31_v2  ;;  %s1646_s27 = sld [smem:[#allocation4 + $0x80]] }
  0x20   :  { %1751 = vmatprep.subr.mxu0 %v30_v3  ;;  %1770 = vmatprep.subr.mxu1 %v30_v3  ;;  %s1270_s28 = sld [smem:[#allocation4]] }
  0x21   :  { %1752 = vmatpush3.msra.mxu0 %v30_v3  ;;  %1771 = vmatpush3.msra.mxu1 %v30_v3  ;;  %s1648_s29 = sld [smem:[#allocation4 + $0x81]] }
  0x22   :  { %1753 = vmatprep.subr.mxu0 %v29_v4  ;;  %1772 = vmatprep.subr.mxu1 %v29_v4  ;;  %s1594_s9 = scalar_lea.vmem %s2432_s4, %s1644_s0  ;;  %s1636_s10 = sld [smem:[#allocation4 + $0x1]] }
  0x23   :  { %1754 = vmatpush3.msra.mxu0 %v29_v4  ;;  %1773 = vmatpush3.msra.mxu1 %v29_v4  ;;  %s1580_s13 = scalar_lea.vmem %s2432_s4, %s1261_s1  ;;  %s1650_s20 = sld [smem:[#allocation4 + $0x82]] }
  0x24   :  { %1755 = vmatprep.subr.mxu0 %v28_v5  ;;  %1774 = vmatprep.subr.mxu1 %v28_v5  ;;  %s1582_s16 = scalar_lea.vmem %s2432_s4, %s1633_s2  ;;  %s1638_s21 = sld [smem:[#allocation4 + $0x2]] }
  0x25   :  { %1756 = vmatpush3.msra.mxu0 %v28_v5  ;;  %1775 = vmatpush3.msra.mxu1 %v28_v5  ;;  %s1596_s19 = scalar_lea.vmem %s2432_s4, %s1646_s27  ;;  %s1652_s1 = sld [smem:[#allocation4 + $0x83]] }
  0x26   :  { %1757 = vmatprep.subr.mxu0 %v27_v6  ;;  %1776 = vmatprep.subr.mxu1 %v27_v6  ;;  %s1584_s24 = scalar_lea.vmem %s2432_s4, %s1270_s28  ;;  %s1640_s2 = sld [smem:[#allocation4 + $0x3]] }
  0x27   :  { %1758 = vmatpush3.msra.mxu0 %v27_v6  ;;  %1777 = vmatpush3.msra.mxu1 %v27_v6  ;;  %s1598_s0 = scalar_lea.vmem %s2432_s4, %s1648_s29 }
  0x28   :  { %1759 = vmatprep.subr.mxu0 %v26_v7  ;;  %1778 = vmatprep.subr.mxu1 %v26_v7  ;;  %s1586_s6 = scalar_lea.vmem %s2432_s4, %s1636_s10 }
  0x29   :  { %1760 = vmatpush3.msra.mxu0 %v26_v7  ;;  %1761 = vmatprep.mubr.msk.f32.mxu0 %vm45_vm1, %v39_v8  ;;  %s1600_s8 = scalar_lea.vmem %s2432_s4, %s1650_s20 }
  0x2a   :  { %1779 = vmatpush3.msra.mxu1 %v26_v7  ;;  %1780 = vmatprep.mubr.msk.f32.mxu1 %vm45_vm1, %v1608_v9 }
  0x2b   :  { %1762 = vmatmul.mubr.msk.f32.vlgmr.msra.gmra.mxu0 %vm45_vm1, %v40_v10  ;;  %1781 = vmatmul.mubr.msk.f32.vlgmr.msra.gmra.mxu1 %vm45_vm1, %v1609_v11 }
  0x2c   :  { %1783 = vmatprep.subr.mxu0 %v2040_v13  ;;  %1791 = vmatprep.mubr.msk.f32.mxu0 %vm2041_vm2, %v2040_v13  ;;  %s1590_s15 = scalar_lea.vmem %s2432_s4, %s1640_s2 }
  0x2d   :  { %1784 = vmatpush3.msra.mxu0 %v2119_v12  ;;  %1794 = vmatprep.subr.mxu1 %v2040_v13 }
  0x2e   :  { %1785 = vmatprep.subr.mxu0 %v2040_v13  ;;  %1795 = vmatpush3.msra.mxu1 %v2119_v12 }
  0x2f   :  { %1786 = vmatpush3.msra.mxu0 %v2125_v14  ;;  %1796 = vmatprep.subr.mxu1 %v2040_v13 }
  0x30   :  { %1787 = vmatprep.subr.mxu0 %v2040_v13  ;;  %1797 = vmatpush3.msra.mxu1 %v2125_v14 }
  0x31   :  { %1788 = vmatpush3.msra.mxu0 %v2135_v15  ;;  %1798 = vmatprep.subr.mxu1 %v2040_v13 }
  0x32   :  { %1789 = vmatprep.subr.mxu0 %v2040_v13  ;;  %1799 = vmatpush3.msra.mxu1 %v2135_v15 }
  0x33   :  { %1790 = vmatpush3.msra.mxu0 %v2144_v16  ;;  %1800 = vmatprep.subr.mxu1 %v2040_v13 }
  0x34   :  { %1792 = vmatmul.mubr.f32.vlgmr.msra.gmra.mxu0 %v2040_v13  ;;  %1801 = vmatpush3.msra.mxu1 %v2144_v16 }
  0x35   :  { %1802 = vmatprep.mubr.msk.f32.mxu1 %vm2041_vm2, %v2040_v13  ;;  %1805 = vmatprep.subr.mxu0 %v2040_v13 }
  0x36   :  { %1806 = vmatpush3.msra.mxu0 %v2119_v12  ;;  %1813 = vmatprep.mubr.msk.f32.mxu0 %vm2041_vm2, %v2040_v13 }
  0x37   :  { %1807 = vmatprep.subr.mxu0 %v2040_v13  ;;  %1816 = vmatprep.subr.mxu1 %v2040_v13 }
  0x38   :  { %1808 = vmatpush3.msra.mxu0 %v2125_v14 }
  0x39   :  { %1809 = vmatprep.subr.mxu0 %v2040_v13 }
  0x3a   :  { %1810 = vmatpush3.msra.mxu0 %v2135_v15 }
  0x3b   :  { %1811 = vmatprep.subr.mxu0 %v2040_v13 }
  0x3c   :  { %1812 = vmatpush3.msra.mxu0 %v2144_v16 }
  0x3d   :  { %1827 = vmatprep.subr.mxu0 %v2040_v13 }
  0xeb   :  { %v1763_v18 = vpop.f32.mrf.mxu0  ;;  %v1782_v19 = vpop.f32.mrf.mxu1 }
  0xec   :  { %v128_v20 = vadd.f32 %v1763_v18, %v1604_v17  ;;  %v212_v21 = vadd.f32 %v1782_v19, %v1604_v17 }
  0xed   :  { %v122_v22 = vpop.f32.mrf.mxu0  ;;  %v206_v23 = vpop.f32.mrf.mxu1 }
  0xee   :  { %v123_v24 = vadd.f32 %v1604_v17, %v122_v22  ;;  %v207_v25 = vadd.f32 %v1604_v17, %v206_v23  ;;  %v259_v26 = vrot.slane %v128_v20, 1  ;;  %v255_v27 = vrot.slane %v212_v21, 7 }
  0xf0   :  { %v216_v28 = vrot.slane %v207_v25, 7  ;;  %v221_v29 = vrot.slane %v123_v24, 1  ;;  %v224_v30 = vrot.slane %v123_v24, 2  ;;  %v226_v31 = vrot.slane %v207_v25, 1 }
  0xf1   :  { %v229_v32 = vrot.slane %v123_v24, 3  ;;  %v231_v33 = vrot.slane %v207_v25, 2  ;;  %v234_v34 = vrot.slane %v123_v24, 4  ;;  %v236_v35 = vrot.slane %v207_v25, 3 }
  0xf2   :  { %v219_v36 = vsel %vm218_vm3, %v123_v24, %v216_v28  ;;  %v223_v37 = vsel %vm218_vm3, %v221_v29, %v207_v25  ;;  %v2175_v38 = vsel %vm218_vm3, %v224_v30, %v226_v31  ;;  %v239_v39 = vrot.slane %v123_v24, 5 }
  0xf3   :  { %v2178_v40 = vsel %vm218_vm3, %v229_v32, %v231_v33  ;;  %v2181_v41 = vsel %vm218_vm3, %v234_v34, %v236_v35  ;;  %v241_v42 = vrot.slane %v207_v25, 4  ;;  %v244_v43 = vrot.slane %v123_v24, 6 }
  0xf4   :  { %v332_v44 = vpop.f32.mrf.mxu0  ;;  %v246_v45 = vrot.slane %v207_v25, 5  ;;  %v249_v46 = vrot.slane %v123_v24, 7  ;;  %v251_v47 = vrot.slane %v207_v25, 6  ;;  %v2184_v48 = vsel %vm218_vm3, %v128_v20, %v255_v27 }
  0xf5   :  { %v336_v49 = vadd.f32 %v332_v44, %v219_v36  ;;  %v2187_v50 = vsel %vm218_vm3, %v239_v39, %v241_v42  ;;  %v2190_v51 = vsel %vm218_vm3, %v259_v26, %v212_v21 }
  0xf6   :  { %v1793_v52 = vpop.f32.mrf.mxu0  ;;  %v2193_v53 = vsel %vm218_vm3, %v244_v43, %v246_v45  ;;  %v2196_v54 = vsel %vm218_vm3, %v249_v46, %v251_v47 }
  0xf7   :  { %1932 = vtanh.f32 %v336_v49  ;;  %v1613_v56 = vmul.f32 -1.442695, %v336_v49 }
  0xf9   :  { %1934 = vpow2.f32 %v1613_v56 }
 0x104   :  { %v1933_v55 = vpop.eup %1932 }
 0x105   :  { %346 = vrot.lane.b32.xlu0 %v1933_v55, %s2042_s3 }
 0x106   :  { %v1935_v57 = vpop.eup %1934 }
 0x107   :  { %v340_v58 = vadd.f32 1.0, %v1935_v57 }
 0x109   :  { %1936 = vrcp.f32 %v340_v58 }
 0x116   :  { %v1937_v59 = vpop.eup %1936 }
 0x117   :  { %v344_v62 = vmul.f32 0.0, %v1937_v59 }
 0x177   :  { %v347_v60 = vpop.permute.xlu0 %346 }
 0x178   :  { %v349_v61 = vmul.f32 %v1937_v59, %v347_v60 }
 0x17a   :  { %351 = vrot.lane.b32.xlu0 %v349_v61, %s2042_s3 }
 0x1ec   :  { %v352_v63 = vpop.permute.xlu0 %351 }
 0x1ed   :  { %v354_v0 = vadd.f32 %v352_v63, %v344_v62 }
 0x1ef   :  { %1938 = vtanh.f32 %v354_v0 }
 0x1fc   :  { %v1939_v1 = vpop.eup %1938 }
 0x1fd   :  { %357 = vrot.lane.b32.xlu1 %v1939_v1, %s2042_s3 }
 0x26f   :  { %v358_v2 = vpop.permute.xlu1 %357 }
 0x270   :  { %v360_v3 = vmul.f32 %v1937_v59, %v358_v2 }
 0x272   :  { %362 = vrot.lane.b32.xlu1 %v360_v3, %s2043_s7 }
 0x2e4   :  { %v363_v4 = vpop.permute.xlu1 %362 }
 0x2e5   :  { %1803 = vmatmul.mubr.msk.f32.vlgmr.msra.gmra.mxu1 %vm262_vm4, %v363_v4 }
 0x2e6   :  { %1817 = vmatpush3.msra.mxu1 %v2119_v12  ;;  %1824 = vmatprep.mubr.msk.f32.mxu1 %vm2041_vm2, %v2040_v13 }
 0x2e7   :  { %1818 = vmatprep.subr.mxu1 %v2040_v13 }
 0x2e8   :  { %1819 = vmatpush3.msra.mxu1 %v2125_v14 }
 0x2e9   :  { %1820 = vmatprep.subr.mxu1 %v2040_v13 }
 0x2ea   :  { %1821 = vmatpush3.msra.mxu1 %v2135_v15 }
 0x2eb   :  { %1822 = vmatprep.subr.mxu1 %v2040_v13 }
 0x2ec   :  { %1823 = vmatpush3.msra.mxu1 %v2144_v16 }
 0x2ed   :  { %1838 = vmatprep.subr.mxu1 %v2040_v13 }
 0x3a5   :  { %v432_v5 = vpop.f32.mrf.mxu1 }
 0x3a6   :  { %v436_v6 = vadd.f32 %v432_v5, %v223_v37 }
 0x3a7   :  { %v1804_v7 = vpop.f32.mrf.mxu1 }
 0x3a8   :  { %1940 = vtanh.f32 %v436_v6  ;;  %v1615_v9 = vmul.f32 -1.442695, %v436_v6 }
 0x3aa   :  { %1942 = vpow2.f32 %v1615_v9 }
 0x3b5   :  { %v1941_v8 = vpop.eup %1940 }
 0x3b6   :  { %446 = vrot.lane.b32.xlu0 %v1941_v8, %s2042_s3 }
 0x3b7   :  { %v1943_v10 = vpop.eup %1942 }
 0x3b8   :  { %v440_v11 = vadd.f32 1.0, %v1943_v10 }
 0x3ba   :  { %1944 = vrcp.f32 %v440_v11 }
 0x3c7   :  { %v1945_v17 = vpop.eup %1944 }
 0x3c8   :  { %v444_v20 = vmul.f32 %v1945_v17, %v354_v0 }
 0x428   :  { %v447_v18 = vpop.permute.xlu0 %446 }
 0x429   :  { %v449_v19 = vmul.f32 %v1945_v17, %v447_v18 }
 0x42b   :  { %451 = vrot.lane.b32.xlu1 %v449_v19, %s2042_s3 }
 0x49d   :  { %v452_v21 = vpop.permute.xlu1 %451 }
 0x49e   :  { %v454_v22 = vadd.f32 %v452_v21, %v444_v20 }
 0x4a0   :  { %1946 = vtanh.f32 %v454_v22 }
 0x4ad   :  { %v1947_v23 = vpop.eup %1946 }
 0x4ae   :  { %457 = vrot.lane.b32.xlu0 %v1947_v23, %s2042_s3 }
 0x520   :  { %v458_v24 = vpop.permute.xlu0 %457 }
 0x521   :  { %v460_v25 = vmul.f32 %v1945_v17, %v458_v24 }
 0x523   :  { %462 = vrot.lane.b32.xlu1 %v460_v25, %s2043_s7 }
 0x595   :  { %v463_v26 = vpop.permute.xlu1 %462 }
 0x596   :  { %1814 = vmatmul.mubr.msk.f32.vlgmr.msra.gmra.mxu0 %vm262_vm4, %v463_v26 }
 0x597   :  { %1828 = vmatpush3.msra.mxu0 %v2119_v12  ;;  %1835 = vmatprep.mubr.msk.f32.mxu0 %vm2041_vm2, %v2040_v13 }
 0x598   :  { %1829 = vmatprep.subr.mxu0 %v2040_v13 }
 0x599   :  { %1830 = vmatpush3.msra.mxu0 %v2125_v14 }
 0x59a   :  { %1831 = vmatprep.subr.mxu0 %v2040_v13 }
 0x59b   :  { %1832 = vmatpush3.msra.mxu0 %v2135_v15 }
 0x59c   :  { %1833 = vmatprep.subr.mxu0 %v2040_v13 }
 0x59d   :  { %1834 = vmatpush3.msra.mxu0 %v2144_v16 }
 0x59e   :  { %1849 = vmatprep.subr.mxu0 %v2040_v13 }
 0x656   :  { %v532_v27 = vpop.f32.mrf.mxu0 }
 0x657   :  { %v536_v28 = vadd.f32 %v532_v27, %v2175_v38 }
 0x658   :  { %v1815_v29 = vpop.f32.mrf.mxu0 }
 0x659   :  { %1948 = vtanh.f32 %v536_v28  ;;  %v1617_v31 = vmul.f32 -1.442695, %v536_v28 }
 0x65b   :  { %1950 = vpow2.f32 %v1617_v31 }
 0x666   :  { %v1949_v30 = vpop.eup %1948 }
 0x667   :  { %546 = vrot.lane.b32.xlu0 %v1949_v30, %s2042_s3 }
 0x668   :  { %v1951_v32 = vpop.eup %1950 }
 0x669   :  { %v540_v33 = vadd.f32 1.0, %v1951_v32 }
 0x66b   :  { %1952 = vrcp.f32 %v540_v33 }
 0x678   :  { %v1953_v34 = vpop.eup %1952 }
 0x679   :  { %v544_v37 = vmul.f32 %v1953_v34, %v454_v22 }
 0x6d9   :  { %v547_v35 = vpop.permute.xlu0 %546 }
 0x6da   :  { %v549_v36 = vmul.f32 %v1953_v34, %v547_v35 }
 0x6dc   :  { %551 = vrot.lane.b32.xlu1 %v549_v36, %s2042_s3 }
 0x74e   :  { %v552_v39 = vpop.permute.xlu1 %551 }
 0x74f   :  { %v554_v42 = vadd.f32 %v552_v39, %v544_v37 }
 0x751   :  { %1954 = vtanh.f32 %v554_v42 }
 0x75e   :  { %v1955_v38 = vpop.eup %1954 }
 0x75f   :  { %557 = vrot.lane.b32.xlu0 %v1955_v38, %s2042_s3 }
 0x7d1   :  { %v558_v43 = vpop.permute.xlu0 %557 }
 0x7d2   :  { %v560_v44 = vmul.f32 %v1953_v34, %v558_v43 }
 0x7d4   :  { %562 = vrot.lane.b32.xlu1 %v560_v44, %s2043_s7 }
 0x846   :  { %v563_v45 = vpop.permute.xlu1 %562 }
 0x847   :  { %1825 = vmatmul.mubr.msk.f32.vlgmr.msra.gmra.mxu1 %vm262_vm4, %v563_v45 }
 0x848   :  { %1839 = vmatpush3.msra.mxu1 %v2119_v12  ;;  %1846 = vmatprep.mubr.msk.f32.mxu1 %vm2041_vm2, %v2040_v13 }
 0x849   :  { %1840 = vmatprep.subr.mxu1 %v2040_v13 }
 0x84a   :  { %1841 = vmatpush3.msra.mxu1 %v2125_v14 }
 0x84b   :  { %1842 = vmatprep.subr.mxu1 %v2040_v13 }
 0x84c   :  { %1843 = vmatpush3.msra.mxu1 %v2135_v15 }
 0x84d   :  { %1844 = vmatprep.subr.mxu1 %v2040_v13 }
 0x84e   :  { %1845 = vmatpush3.msra.mxu1 %v2144_v16 }
 0x84f   :  { %1860 = vmatprep.subr.mxu1 %v2040_v13 }
 0x907   :  { %v632_v46 = vpop.f32.mrf.mxu1 }
 0x908   :  { %v636_v47 = vadd.f32 %v632_v46, %v2178_v40 }
 0x909   :  { %v1826_v49 = vpop.f32.mrf.mxu1 }
 0x90a   :  { %1956 = vtanh.f32 %v636_v47  ;;  %v1619_v55 = vmul.f32 -1.442695, %v636_v47 }
 0x90c   :  { %1958 = vpow2.f32 %v1619_v55 }
 0x917   :  { %v1957_v52 = vpop.eup %1956 }
 0x918   :  { %646 = vrot.lane.b32.xlu0 %v1957_v52, %s2042_s3 }
 0x919   :  { %v1959_v56 = vpop.eup %1958 }
 0x91a   :  { %v640_v57 = vadd.f32 1.0, %v1959_v56 }
 0x91c   :  { %1960 = vrcp.f32 %v640_v57 }
 0x929   :  { %v1961_v58 = vpop.eup %1960 }
 0x92a   :  { %v644_v61 = vmul.f32 %v1961_v58, %v554_v42 }
 0x98a   :  { %v647_v59 = vpop.permute.xlu0 %646 }
 0x98b   :  { %v649_v60 = vmul.f32 %v1961_v58, %v647_v59 }
 0x98d   :  { %651 = vrot.lane.b32.xlu1 %v649_v60, %s2042_s3 }
 0x9ff   :  { %v652_v62 = vpop.permute.xlu1 %651 }
 0xa00   :  { %v654_v63 = vadd.f32 %v652_v62, %v644_v61 }
 0xa02   :  { %1962 = vtanh.f32 %v654_v63 }
 0xa0f   :  { %v1963_v40 = vpop.eup %1962 }
 0xa10   :  { %657 = vrot.lane.b32.xlu0 %v1963_v40, %s2042_s3 }
 0xa82   :  { %v658_v0 = vpop.permute.xlu0 %657 }
 0xa83   :  { %v660_v1 = vmul.f32 %v1961_v58, %v658_v0 }
 0xa85   :  { %662 = vrot.lane.b32.xlu1 %v660_v1, %s2043_s7 }
 0xaf7   :  { %v663_v2 = vpop.permute.xlu1 %662 }
 0xaf8   :  { %1836 = vmatmul.mubr.msk.f32.vlgmr.msra.gmra.mxu0 %vm262_vm4, %v663_v2 }
 0xaf9   :  { %1850 = vmatpush3.msra.mxu0 %v2119_v12  ;;  %1857 = vmatprep.mubr.msk.f32.mxu0 %vm2041_vm2, %v2040_v13 }
 0xafa   :  { %1851 = vmatprep.subr.mxu0 %v2040_v13 }
 0xafb   :  { %1852 = vmatpush3.msra.mxu0 %v2125_v14 }
 0xafc   :  { %1853 = vmatprep.subr.mxu0 %v2040_v13 }
 0xafd   :  { %1854 = vmatpush3.msra.mxu0 %v2135_v15 }
 0xafe   :  { %1855 = vmatprep.subr.mxu0 %v2040_v13 }
 0xaff   :  { %1856 = vmatpush3.msra.mxu0 %v2144_v16 }
 0xb00   :  { %1871 = vmatprep.subr.mxu0 %v2040_v13 }
 0xbb8   :  { %v732_v3 = vpop.f32.mrf.mxu0 }
 0xbb9   :  { %v736_v4 = vadd.f32 %v732_v3, %v2181_v41 }
 0xbba   :  { %v1837_v5 = vpop.f32.mrf.mxu0 }
 0xbbb   :  { %1964 = vtanh.f32 %v736_v4  ;;  %v1621_v7 = vmul.f32 -1.442695, %v736_v4 }
 0xbbd   :  { %1966 = vpow2.f32 %v1621_v7 }
 0xbc8   :  { %v1965_v6 = vpop.eup %1964 }
 0xbc9   :  { %746 = vrot.lane.b32.xlu0 %v1965_v6, %s2042_s3 }
 0xbca   :  { %v1967_v8 = vpop.eup %1966 }
 0xbcb   :  { %v740_v9 = vadd.f32 1.0, %v1967_v8 }
 0xbcd   :  { %1968 = vrcp.f32 %v740_v9 }
 0xbda   :  { %v1969_v10 = vpop.eup %1968 }
 0xbdb   :  { %v744_v18 = vmul.f32 %v1969_v10, %v654_v63 }
 0xc3b   :  { %v747_v11 = vpop.permute.xlu0 %746 }
 0xc3c   :  { %v749_v17 = vmul.f32 %v1969_v10, %v747_v11 }
 0xc3e   :  { %751 = vrot.lane.b32.xlu1 %v749_v17, %s2042_s3 }
 0xcb0   :  { %v752_v19 = vpop.permute.xlu1 %751 }
 0xcb1   :  { %v754_v20 = vadd.f32 %v752_v19, %v744_v18 }
 0xcb3   :  { %1970 = vtanh.f32 %v754_v20 }
 0xcc0   :  { %v1971_v41 = vpop.eup %1970 }
 0xcc1   :  { %757 = vrot.lane.b32.xlu0 %v1971_v41, %s2042_s3 }
 0xd33   :  { %v758_v21 = vpop.permute.xlu0 %757 }
 0xd34   :  { %v760_v22 = vmul.f32 %v1969_v10, %v758_v21 }
 0xd36   :  { %762 = vrot.lane.b32.xlu1 %v760_v22, %s2043_s7 }
 0xda8   :  { %v763_v23 = vpop.permute.xlu1 %762 }
 0xda9   :  { %1847 = vmatmul.mubr.msk.f32.vlgmr.msra.gmra.mxu1 %vm262_vm4, %v763_v23 }
 0xdaa   :  { %1861 = vmatpush3.msra.mxu1 %v2119_v12  ;;  %1868 = vmatprep.mubr.msk.f32.mxu1 %vm2041_vm2, %v2040_v13 }
 0xdab   :  { %1862 = vmatprep.subr.mxu1 %v2040_v13 }
 0xdac   :  { %1863 = vmatpush3.msra.mxu1 %v2125_v14 }
 0xdad   :  { %1864 = vmatprep.subr.mxu1 %v2040_v13 }
 0xdae   :  { %1865 = vmatpush3.msra.mxu1 %v2135_v15 }
 0xdaf   :  { %1866 = vmatprep.subr.mxu1 %v2040_v13 }
 0xdb0   :  { %1867 = vmatpush3.msra.mxu1 %v2144_v16 }
 0xdb1   :  { %1882 = vmatprep.subr.mxu1 %v2040_v13 }
 0xe69   :  { %v832_v24 = vpop.f32.mrf.mxu1 }
 0xe6a   :  { %v836_v25 = vadd.f32 %v832_v24, %v2187_v50 }
 0xe6b   :  { %v1848_v26 = vpop.f32.mrf.mxu1 }
 0xe6c   :  { %1972 = vtanh.f32 %v836_v25  ;;  %v1623_v28 = vmul.f32 -1.442695, %v836_v25 }
 0xe6e   :  { %1974 = vpow2.f32 %v1623_v28 }
 0xe79   :  { %v1973_v27 = vpop.eup %1972 }
 0xe7a   :  { %846 = vrot.lane.b32.xlu0 %v1973_v27, %s2042_s3 }
 0xe7b   :  { %v1975_v29 = vpop.eup %1974 }
 0xe7c   :  { %v840_v30 = vadd.f32 1.0, %v1975_v29 }
 0xe7e   :  { %1976 = vrcp.f32 %v840_v30 }
 0xe8b   :  { %v1977_v31 = vpop.eup %1976 }
 0xe8c   :  { %v844_v34 = vmul.f32 %v1977_v31, %v754_v20 }
 0xeec   :  { %v847_v32 = vpop.permute.xlu0 %846 }
 0xeed   :  { %v849_v33 = vmul.f32 %v1977_v31, %v847_v32 }
 0xeef   :  { %851 = vrot.lane.b32.xlu1 %v849_v33, %s2042_s3 }
 0xf61   :  { %v852_v35 = vpop.permute.xlu1 %851 }
 0xf62   :  { %v854_v36 = vadd.f32 %v852_v35, %v844_v34 }
 0xf64   :  { %1978 = vtanh.f32 %v854_v36 }
 0xf71   :  { %v1979_v50 = vpop.eup %1978 }
 0xf72   :  { %857 = vrot.lane.b32.xlu0 %v1979_v50, %s2042_s3 }
 0xfe4   :  { %v858_v37 = vpop.permute.xlu0 %857 }
 0xfe5   :  { %v860_v39 = vmul.f32 %v1977_v31, %v858_v37 }
 0xfe7   :  { %862 = vrot.lane.b32.xlu1 %v860_v39, %s2043_s7 }
0x1059   :  { %v863_v42 = vpop.permute.xlu1 %862 }
0x105a   :  { %1858 = vmatmul.mubr.msk.f32.vlgmr.msra.gmra.mxu0 %vm262_vm4, %v863_v42 }
0x105b   :  { %1872 = vmatpush3.msra.mxu0 %v2119_v12  ;;  %1879 = vmatprep.mubr.msk.f32.mxu0 %vm2041_vm2, %v2040_v13 }
0x105c   :  { %1873 = vmatprep.subr.mxu0 %v2040_v13 }
0x105d   :  { %1874 = vmatpush3.msra.mxu0 %v2125_v14 }
0x105e   :  { %1875 = vmatprep.subr.mxu0 %v2040_v13 }
0x105f   :  { %1876 = vmatpush3.msra.mxu0 %v2135_v15 }
0x1060   :  { %1877 = vmatprep.subr.mxu0 %v2040_v13 }
0x1061   :  { %1878 = vmatpush3.msra.mxu0 %v2144_v16 }
0x1062   :  { %1893 = vmatprep.subr.mxu0 %v2040_v13 }
0x111a   :  { %v932_v38 = vpop.f32.mrf.mxu0 }
0x111b   :  { %v936_v43 = vadd.f32 %v932_v38, %v2193_v53 }
0x111c   :  { %v1859_v44 = vpop.f32.mrf.mxu0 }
0x111d   :  { %1980 = vtanh.f32 %v936_v43  ;;  %v1625_v46 = vmul.f32 -1.442695, %v936_v43  ;;  %v1325_v44 = vld [vmem:[%s2432_s4 + $0x10] sm:$0xff] }
0x111f   :  { %1982 = vpow2.f32 %v1625_v46  ;;  %v1323_v46 = vld [vmem:[%s2432_s4] sm:$0xff] }
0x112a   :  { %v1981_v45 = vpop.eup %1980 }
0x112b   :  { %946 = vrot.lane.b32.xlu0 %v1981_v45, %s2042_s3  ;;  %v1324_v45 = vld [vmem:[%s2432_s4 + $0x8] sm:$0xff] }
0x112c   :  { %v1983_v47 = vpop.eup %1982 }
0x112d   :  { %v940_v49 = vadd.f32 1.0, %v1983_v47 }
0x112f   :  { %1984 = vrcp.f32 %v940_v49 }
0x113c   :  { %v1985_v52 = vpop.eup %1984 }
0x113d   :  { %v944_v57 = vmul.f32 %v1985_v52, %v854_v36 }
0x119d   :  { %v947_v55 = vpop.permute.xlu0 %946 }
0x119e   :  { %v949_v56 = vmul.f32 %v1985_v52, %v947_v55 }
0x11a0   :  { %951 = vrot.lane.b32.xlu1 %v949_v56, %s2042_s3  ;;  %v1412_v56 = vld [vmem:[%s2432_s4 + $0x40] sm:$0xff] }
0x1212   :  { %v952_v58 = vpop.permute.xlu1 %951 }
0x1213   :  { %v954_v59 = vadd.f32 %v952_v58, %v944_v57  ;;  %v1411_v57 = vld [vmem:[%s2432_s4 + $0x38] sm:$0xff]  ;;  %v1410_v58 = vld [vmem:[%s2432_s4 + $0x30] sm:$0xff] }
0x1215   :  { %1986 = vtanh.f32 %v954_v59 }
0x1222   :  { %v1987_v53 = vpop.eup %1986 }
0x1223   :  { %957 = vrot.lane.b32.xlu0 %v1987_v53, %s2042_s3  ;;  %v1495_v53 = vld [vmem:[%s2432_s4 + $0x68] sm:$0xff] }
0x1295   :  { %v958_v60 = vpop.permute.xlu0 %957 }
0x1296   :  { %v960_v61 = vmul.f32 %v1985_v52, %v958_v60 }
0x1298   :  { %962 = vrot.lane.b32.xlu1 %v960_v61, %s2043_s7  ;;  %v1645_v61 = vld [vmem:[%s1594_s9 + $0x87] sm:$0x1]  ;;  %s1588_s9 = scalar_lea.vmem %s2432_s4, %s1638_s21 }
0x130a   :  { %v963_v62 = vpop.permute.xlu1 %962 }
0x130b   :  { %1869 = vmatmul.mubr.msk.f32.vlgmr.msra.gmra.mxu1 %vm262_vm4, %v963_v62 }
0x130c   :  { %1883 = vmatpush3.msra.mxu1 %v2119_v12  ;;  %1890 = vmatprep.mubr.msk.f32.mxu1 %vm2041_vm2, %v2040_v13 }
0x130d   :  { %1884 = vmatprep.subr.mxu1 %v2040_v13 }
0x130e   :  { %1885 = vmatpush3.msra.mxu1 %v2125_v14 }
0x130f   :  { %1886 = vmatprep.subr.mxu1 %v2040_v13 }
0x1310   :  { %1887 = vmatpush3.msra.mxu1 %v2135_v15 }
0x1311   :  { %1888 = vmatprep.subr.mxu1 %v2040_v13 }
0x1312   :  { %1889 = vmatpush3.msra.mxu1 %v2144_v16 }
0x1313   :  { %1904 = vmatprep.subr.mxu1 %v2040_v13 }
0x13cb   :  { %v1032_v63 = vpop.f32.mrf.mxu1 }
0x13cc   :  { %v1036_v12 = vadd.f32 %v1032_v63, %v2196_v54  ;;  %v1632_v63 = vld [vmem:[%s1580_s13 + $0x78] sm:$0x1]  ;;  %s1602_s13 = scalar_lea.vmem %s2432_s4, %s1652_s1 }
0x13cd   :  { %v1870_v40 = vpop.f32.mrf.mxu1 }
0x13ce   :  { %1988 = vtanh.f32 %v1036_v12  ;;  %v1627_v1 = vmul.f32 -1.442695, %v1036_v12  ;;  %v1634_v12 = vld [vmem:[%s1582_s16 + $0x87] sm:$0x1]  ;;  %v1647_v40 = vld [vmem:[%s1596_s19 + $0x96] sm:$0x1] }
0x13d0   :  { %1990 = vpow2.f32 %v1627_v1 }
0x13db   :  { %v1989_v0 = vpop.eup %1988 }
0x13dc   :  { %1046 = vrot.lane.b32.xlu0 %v1989_v0, %s2042_s3  ;;  %v1269_v0 = vadd.f32 %v1634_v12, %v1632_v63 }
0x13dd   :  { %v1991_v14 = vpop.eup %1990 }
0x13de   :  { %v1040_v2 = vadd.f32 1.0, %v1991_v14  ;;  %v1635_v14 = vld [vmem:[%s1584_s24 + $0x96] sm:$0x1] }
0x13e0   :  { %1992 = vrcp.f32 %v1040_v2  ;;  %v1649_v2 = vld [vmem:[%s1598_s0 + $0x104] sm:$0x1] }
0x13ed   :  { %v1993_v15 = vpop.eup %1992 }
0x13ee   :  { %v1044_v16 = vmul.f32 %v1993_v15, %v954_v59  ;;  %v1409_v59 = vld [vmem:[%s2432_s4 + $0x28] sm:$0xff] }
0x144e   :  { %v1047_v3 = vpop.permute.xlu0 %1046 }
0x144f   :  { %v1049_v4 = vmul.f32 %v1993_v15, %v1047_v3 }
0x1451   :  { %1051 = vrot.lane.b32.xlu1 %v1049_v4, %s2042_s3  ;;  %v1637_v4 = vld [vmem:[%s1586_s6 + $0x104] sm:$0x1] }
0x14c3   :  { %v1052_v5 = vpop.permute.xlu1 %1051 }
0x14c4   :  { %v1054_v6 = vadd.f32 %v1052_v5, %v1044_v16  ;;  %v1651_v16 = vld [vmem:[%s1600_s8 + $0x108] sm:$0x1] }
0x14c6   :  { %1994 = vtanh.f32 %v1054_v6 }
0x14d3   :  { %v1995_v54 = vpop.eup %1994 }
0x14d4   :  { %1057 = vrot.lane.b32.xlu0 %v1995_v54, %s2042_s3  ;;  %v1639_v54 = vld [vmem:[%s1588_s9 + $0x108] sm:$0x1] }
0x1546   :  { %v1058_v7 = vpop.permute.xlu0 %1057 }
0x1547   :  { %v1060_v8 = vmul.f32 %v1993_v15, %v1058_v7  ;;  %v1274_v15 = vadd.f32 %v1635_v14, %v1269_v0  ;;  %v1653_v7 = vld [vmem:[%s1602_s13 + $0x10b] sm:$0x1] }
0x1549   :  { %1062 = vrot.lane.b32.xlu1 %v1060_v8, %s2043_s7  ;;  %v1279_v5 = vadd.f32 %v1637_v4, %v1274_v15 }
0x154b   :  { %v1284_v8 = vadd.f32 %v1639_v54, %v1279_v5 }
0x15bb   :  { %v1063_v9 = vpop.permute.xlu1 %1062 }
0x15bc   :  { %1880 = vmatmul.mubr.msk.f32.vlgmr.msra.gmra.mxu0 %vm262_vm4, %v1063_v9 }
0x15bd   :  { %1901 = vmatprep.mubr.msk.f32.mxu0 %vm2041_vm2, %v2040_v13 }
0x167c   :  { %v1132_v10 = vpop.f32.mrf.mxu0 }
0x167d   :  { %v1136_v11 = vadd.f32 %v1132_v10, %v2184_v48  ;;  %v1641_v10 = vld [vmem:[%s1590_s15 + $0x10b] sm:$0x1] }
0x167e   :  { %v1881_v17 = vpop.f32.mrf.mxu0 }
0x167f   :  { %1996 = vtanh.f32 %v1136_v11  ;;  %v1629_v19 = vmul.f32 -1.442695, %v1136_v11  ;;  %v1289_v11 = vadd.f32 %v1641_v10, %v1284_v8 }
0x1681   :  { %1998 = vpow2.f32 %v1629_v19 }
0x168c   :  { %v1997_v18 = vpop.eup %1996 }
0x168d   :  { %1146 = vrot.lane.b32.xlu0 %v1997_v18, %s2042_s3  ;;  %v1654_v18 = vld [vmem:[%s2432_s4 + $0x20] ss:$0 sm:$0xff] }
0x168e   :  { %v1999_v20 = vpop.eup %1998 }
0x168f   :  { %v1140_v41 = vadd.f32 1.0, %v1999_v20 }
0x1691   :  { %2000 = vrcp.f32 %v1140_v41 }
0x169e   :  { %v2001_v21 = vpop.eup %2000 }
0x169f   :  { %v1144_v24 = vmul.f32 %v2001_v21, %v1054_v6 }
0x16ff   :  { %v1147_v22 = vpop.permute.xlu0 %1146 }
0x1700   :  { %v1149_v23 = vmul.f32 %v2001_v21, %v1147_v22 }
0x1702   :  { %1151 = vrot.lane.b32.xlu1 %v1149_v23, %s2042_s3 }
0x1774   :  { %v1152_v25 = vpop.permute.xlu1 %1151 }
0x1775   :  { %v1154_v26 = vadd.f32 %v1152_v25, %v1144_v24  ;;  %v1494_v24 = vld [vmem:[%s2432_s4 + $0x60] sm:$0xff]  ;;  %v1493_v25 = vld [vmem:[%s2432_s4 + $0x58] sm:$0xff] }
0x1777   :  { %2002 = vtanh.f32 %v1154_v26 }
0x1784   :  { %v2003_v48 = vpop.eup %2002 }
0x1785   :  { %1157 = vrot.lane.b32.xlu0 %v2003_v48, %s2042_s3  ;;  %v1656_v48 = vld [vmem:[%s2432_s4 + $0x48] ss:$0 sm:$0xff] }
0x17f7   :  { %v1158_v27 = vpop.permute.xlu0 %1157 }
0x17f8   :  { %v1160_v28 = vmul.f32 %v2001_v21, %v1158_v27 }
0x17fa   :  { %1162 = vrot.lane.b32.xlu1 %v1160_v28, %s2043_s7 }
0x186c   :  { %v1163_v29 = vpop.permute.xlu1 %1162 }
0x186d   :  { %1891 = vmatmul.mubr.msk.f32.vlgmr.msra.gmra.mxu1 %vm262_vm4, %v1163_v29 }
0x186e   :  { %1912 = vmatprep.mubr.msk.f32.mxu1 %vm2041_vm2, %v2040_v13  ;;  %1905 = vmatpush3.msra.mxu1 %v1412_v56 }
0x186f   :  { %1906 = vmatprep.subr.mxu1 %v2040_v13 }
0x1870   :  { %1907 = vmatpush3.msra.mxu1 %v1411_v57 }
0x1871   :  { %1908 = vmatprep.subr.mxu1 %v2040_v13 }
0x1872   :  { %1909 = vmatpush3.msra.mxu1 %v1410_v58 }
0x1873   :  { %1910 = vmatprep.subr.mxu1 %v2040_v13 }
0x1874   :  { %1911 = vmatpush3.msra.mxu1 %v1409_v59 }
0x192d   :  { %v1232_v30 = vpop.f32.mrf.mxu1 }
0x192e   :  { %v1236_v31 = vadd.f32 %v1232_v30, %v2190_v51  ;;  %v1326_v51 = vld [vmem:[%s2432_s4 + $0x18] sm:$0xff] }
0x192f   :  { %v1892_v32 = vpop.f32.mrf.mxu1  ;;  %1894 = vmatpush3.msra.mxu0 %v1326_v51 }
0x1930   :  { %2004 = vtanh.f32 %v1236_v31  ;;  %v1631_v34 = vmul.f32 -1.442695, %v1236_v31  ;;  %1895 = vmatprep.subr.mxu0 %v2040_v13  ;;  %v1658_v31 = vld [vmem:[%s2432_s4 + $0x70] ss:$0 sm:$0xff] }
0x1931   :  { %1896 = vmatpush3.msra.mxu0 %v1325_v44 }
0x1932   :  { %2006 = vpow2.f32 %v1631_v34  ;;  %1897 = vmatprep.subr.mxu0 %v2040_v13 }
0x1933   :  { %1898 = vmatpush3.msra.mxu0 %v1324_v45 }
0x1934   :  { %1899 = vmatprep.subr.mxu0 %v2040_v13 }
0x1935   :  { %1900 = vmatpush3.msra.mxu0 %v1323_v46 }
0x1936   :  { %1915 = vmatprep.subr.mxu0 %v2040_v13 }
0x193d   :  { %v2005_v33 = vpop.eup %2004 }
0x193e   :  { %1246 = vrot.lane.b32.xlu0 %v2005_v33, %s2042_s3 }
0x193f   :  { %v2007_v35 = vpop.eup %2006 }
0x1940   :  { %v1240_v36 = vadd.f32 1.0, %v2007_v35 }
0x1942   :  { %2008 = vrcp.f32 %v1240_v36 }
0x194f   :  { %v2009_v50 = vpop.eup %2008 }
0x1950   :  { %v1244_v42 = vmul.f32 %v2009_v50, %v1154_v26  ;;  %v1492_v26 = vld [vmem:[%s2432_s4 + $0x50] sm:$0xff] }
0x19b0   :  { %v1247_v37 = vpop.permute.xlu0 %1246 }
0x19b1   :  { %v1249_v39 = vmul.f32 %v2009_v50, %v1247_v37 }
0x19b3   :  { %1251 = vrot.lane.b32.xlu1 %v1249_v39, %s2042_s3 }
0x1a25   :  { %v1252_v38 = vpop.permute.xlu1 %1251 }
0x1a26   :  { %v1254_v43 = vadd.f32 %v1252_v38, %v1244_v42 }
0x1a28   :  { %2010 = vtanh.f32 %v1254_v43 }
0x1a35   :  { %v2011_v47 = vpop.eup %2010 }
0x1a36   :  { %1257 = vrot.lane.b32.xlu0 %v2011_v47, %s2042_s3  ;;  %s1592_s3 = scalar_lea.vmem %s2432_s4, %s1642_s26 }
0x1a37   :  { %v1643_v60 = vld [vmem:[%s1592_s3 + $0x78] sm:$0x1] }
0x1a38   :  { %v1298_v62 = vadd.f32 %v1645_v61, %v1643_v60 }
0x1a3a   :  { %v1303_v1 = vadd.f32 %v1647_v40, %v1298_v62 }
0x1a3c   :  { %v1308_v3 = vadd.f32 %v1649_v2, %v1303_v1 }
0x1a3e   :  { %v1313_v6 = vadd.f32 %v1651_v16, %v1308_v3 }
0x1a40   :  { %v1318_v9 = vadd.f32 %v1653_v7, %v1313_v6 }
0x1a42   :  { %v1320_v17 = vrot.slane %v1318_v9, 7 }
0x1a44   :  { %v1322_v19 = vsel %vm218_vm3, %v1289_v11, %v1320_v17 }
0x1aa8   :  { %v1258_v49 = vpop.permute.xlu0 %1257 }
0x1aa9   :  { %v1260_v52 = vmul.f32 %v2009_v50, %v1258_v49 }
0x1aab   :  { %1333 = vrot.lane.b32.xlu1 %v1260_v52, %s2043_s7 }
0x1b1d   :  { %v1334_v55 = vpop.permute.xlu1 %1333 }
0x1b1e   :  { %1902 = vmatmul.mubr.msk.f32.vlgmr.msra.gmra.mxu0 %vm262_vm4, %v1334_v55 }
0x1b1f   :  { %1923 = vmatprep.mubr.msk.f32.mxu0 %vm2041_vm2, %v2040_v13  ;;  %1916 = vmatpush3.msra.mxu0 %v1495_v53 }
0x1b20   :  { %1917 = vmatprep.subr.mxu0 %v2040_v13 }
0x1b21   :  { %1918 = vmatpush3.msra.mxu0 %v1494_v24 }
0x1b22   :  { %1919 = vmatprep.subr.mxu0 %v2040_v13 }
0x1b23   :  { %1920 = vmatpush3.msra.mxu0 %v1493_v25 }
0x1b24   :  { %1921 = vmatprep.subr.mxu0 %v2040_v13 }
0x1b25   :  { %1922 = vmatpush3.msra.mxu0 %v1492_v26 }
0x1bde   :  { %v1403_v20 = vpop.f32.mrf.mxu0 }
0x1bdf   :  { %v1404_v41 = vadd.f32 %v1654_v18, %v1403_v20 }
0x1be0   :  { %v1903_v21 = vpop.f32.mrf.mxu0 }
0x1be1   :  { %v1407_v22 = vadd.f32 %v1404_v41, %v1322_v19 }
0x1be3   :  { %v1408_v23 = vmax.f32 %v1407_v22, 0.0 }
0x1be5   :  { %1913 = vmatmul.mubr.msk.f32.vlgmr.msra.gmra.mxu1 %vm262_vm4, %v1408_v23 }
0x1ca5   :  { %v1487_v27 = vpop.f32.mrf.mxu1 }
0x1ca6   :  { %v1488_v28 = vadd.f32 %v1656_v48, %v1487_v27 }
0x1ca7   :  { %v1914_v29 = vpop.f32.mrf.mxu1 }
0x1ca8   :  { %v1491_v30 = vmax.f32 %v1488_v28, 0.0 }
0x1caa   :  { %1924 = vmatmul.mubr.msk.f32.vlgmr.msra.gmra.mxu0 %vm262_vm4, %v1491_v30 }
0x1d6a   :  { %v1570_v32 = vpop.f32.mrf.mxu0 }
0x1d6b   :  { %v1571_v33 = vadd.f32 %v1658_v31, %v1570_v32 }
0x1d6c   :  { %v1925_v34 = vpop.f32.mrf.mxu0 }
0x1d6d   :  { %1575 = vst.msk [vmem:[%s2433_s5] sm:$0x3] %vm1574_vm5, %v1571_v33 }

</bundles_post_ra>
